<compile_context>
chip_gen: v7x
topology: tpu7x:2x2x1
jax: 0.10.0
libtpu: 0.0.40
codegen_flags: <defaults>
</compile_context>

<pallas_src>
import jax
import jax.numpy as jnp
from jax.experimental import pallas as pl
from jax.experimental.pallas import tpu as pltpu

IN_DIM = 28 * 28   # 784
HIDDEN = 512
OUT_DIM = 10
N_PAD = 128        # lane-dense padded logits; sliced back to 10 in the wrapper


def mlp_kernel(x_ref, w1_ref, b1_ref, w2_ref, b2_ref, w3_ref, b3_ref, out_ref):
    # Fused 3-layer MLP on one (tile_m, 784) batch tile. Matmul operands are bf16
    # (native MXU dtype); accumulation / bias / ReLU stay in f32.
    x = x_ref[...]                                                        # bf16
    h1 = jnp.dot(x, w1_ref[...], preferred_element_type=jnp.float32)
    h1 = jnp.maximum(h1 + b1_ref[...], 0.0).astype(jnp.bfloat16)
    h2 = jnp.dot(h1, w2_ref[...], preferred_element_type=jnp.float32)
    h2 = jnp.maximum(h2 + b2_ref[...], 0.0).astype(jnp.bfloat16)
    logits = jnp.dot(h2, w3_ref[...], preferred_element_type=jnp.float32)
    out_ref[...] = (logits + b3_ref[...]).astype(out_ref.dtype)          # bf16 writeback


def neural_network_forward(x, params, *, tile_m=512):
    """x: (B, 28, 28) float32. Returns logits (B, 10) float32."""
    w1, b1, w2, b2, w3, b3 = params
    B = x.shape[0]

    # nn.Flatten -- no K padding, no padded HBM copy of the activations.
    x_flat = x.reshape(B, IN_DIM).astype(jnp.bfloat16)

    # Batch tile: >=128 rows, <= tile_m, and capped at ~half the (128-rounded)
    # batch so v7x's two TensorCores both get at least one tile when B > 128.
    half = pl.cdiv(B, 2 * 128) * 128
    tm = max(128, min(tile_m, half))
    Bp = pl.cdiv(B, tm) * tm
    if Bp != B:
        x_flat = jnp.zeros((Bp, IN_DIM), jnp.bfloat16).at[:B].set(x_flat)

    # bf16 weights (halves weight HBM traffic); f32 biases. Only the last layer is
    # padded (10 -> 128 output lanes) so the writeback is lane-dense; the zero
    # columns are mathematically inert and sliced away below.
    w1p = w1.astype(jnp.bfloat16)
    w2p = w2.astype(jnp.bfloat16)
    w3p = jnp.zeros((HIDDEN, N_PAD), jnp.bfloat16).at[:, :OUT_DIM].set(w3.astype(jnp.bfloat16))
    b1p = b1.astype(jnp.float32).reshape(1, HIDDEN)
    b2p = b2.astype(jnp.float32).reshape(1, HIDDEN)
    b3p = jnp.zeros((1, N_PAD), jnp.float32).at[:, :OUT_DIM].set(
        b3.astype(jnp.float32).reshape(1, OUT_DIM))

    n_tiles = Bp // tm
    # Constant block index -> DMA'd once, stays resident in VMEM across grid steps.
    resident = lambda shape: pl.BlockSpec(shape, lambda i: (0, 0))

    flops = 2 * Bp * (IN_DIM * HIDDEN + HIDDEN * HIDDEN + HIDDEN * N_PAD)
    bytes_accessed = (
        Bp * IN_DIM * 2 + Bp * N_PAD * 2                      # bf16 activations in / logits out
        + (w1p.size + w2p.size + w3p.size) * 2                # bf16 weights
        + (b1p.size + b2p.size + b3p.size) * 4                # f32 biases
    )

    out_pad = pl.pallas_call(
        mlp_kernel,
        out_shape=jax.ShapeDtypeStruct((Bp, N_PAD), jnp.bfloat16),
        grid=(n_tiles,),
        in_specs=[
            pl.BlockSpec((tm, IN_DIM), lambda i: (i, 0)),      # batch-tiled activations
            resident((IN_DIM, HIDDEN)),
            resident((1, HIDDEN)),
            resident((HIDDEN, HIDDEN)),
            resident((1, HIDDEN)),
            resident((HIDDEN, N_PAD)),
            resident((1, N_PAD)),
        ],
        out_specs=pl.BlockSpec((tm, N_PAD), lambda i: (i, 0)),
        compiler_params=pltpu.CompilerParams(dimension_semantics=("parallel",)),
        cost_estimate=pl.CostEstimate(
            flops=flops, transcendentals=0, bytes_accessed=bytes_accessed),
    )(x_flat, w1p, b1p, w2p, b2p, w3p, b3p)

    # Drop padded batch rows (they hold relu(bias)-derived garbage) and the
    # 118 padded output lanes; upcast the 10 real logits back to f32.
    return out_pad[:B, :OUT_DIM].astype(jnp.float32)


def init_params(key):
    """Deterministic synthetic init (uniform, like PyTorch's default Linear init,
    scale 1/sqrt(fan_in)). Weights stored as (in, out); biases as (1, out)."""
    keys = jax.random.split(key, 6)

    def linear(kw, kb, fan_in, fan_out):
        bound = 1.0 / jnp.sqrt(fan_in)
        w = jax.random.uniform(kw, (fan_in, fan_out), jnp.float32, -bound, bound)
        b = jax.random.uniform(kb, (1, fan_out), jnp.float32, -bound, bound)
        return w, b

    w1, b1 = linear(keys[0], keys[1], IN_DIM, HIDDEN)
    w2, b2 = linear(keys[2], keys[3], HIDDEN, HIDDEN)
    w3, b3 = linear(keys[4], keys[5], HIDDEN, OUT_DIM)
    return (w1, b1, w2, b2, w3, b3)


def reference_forward(x, params):
    # Mirrors the kernel math (bf16 matmul operands, f32 accumulation/elementwise)
    # so the comparison isolates kernel correctness from the quantization choice.
    w1, b1, w2, b2, w3, b3 = params
    xf = x.reshape(x.shape[0], IN_DIM).astype(jnp.bfloat16)
    h1 = jnp.dot(xf, w1.astype(jnp.bfloat16), preferred_element_type=jnp.float32) + b1
    h1 = jnp.maximum(h1, 0.0).astype(jnp.bfloat16)
    h2 = jnp.dot(h1, w2.astype(jnp.bfloat16), preferred_element_type=jnp.float32) + b2
    h2 = jnp.maximum(h2, 0.0).astype(jnp.bfloat16)
    return jnp.dot(h2, w3.astype(jnp.bfloat16), preferred_element_type=jnp.float32) + b3


if __name__ == "__main__":
    key = jax.random.PRNGKey(0)
    k_x, k_p = jax.random.split(key)

    B = 2
    # Matches `torch.rand(1, 28, 28)` semantics (uniform [0,1)), small batch.
    x = jax.random.uniform(k_x, (B, 28, 28), jnp.float32)
    params = init_params(k_p)

    logits = neural_network_forward(x, params)
    logits = jax.block_until_ready(logits)

    ref = reference_forward(x, params)
    assert logits.shape == (B, OUT_DIM)
    assert jnp.allclose(logits, ref, atol=1e-2, rtol=1e-2)

    print("KERNEL_OK")
</pallas_src>

<mosaic_0001>
module attributes {stable_mosaic.version = 11 : i64} {
  func.func @mlp_kernel(%arg0: i32, %arg1: memref<128x784xbf16, #tpu.memory_space<vmem>>, %arg2: memref<784x512xbf16, #tpu.memory_space<vmem>>, %arg3: memref<1x512xf32, #tpu.memory_space<vmem>>, %arg4: memref<512x512xbf16, #tpu.memory_space<vmem>>, %arg5: memref<1x512xf32, #tpu.memory_space<vmem>>, %arg6: memref<512x128xbf16, #tpu.memory_space<vmem>>, %arg7: memref<1x128xf32, #tpu.memory_space<vmem>>, %arg8: memref<128x128xbf16, #tpu.memory_space<vmem>>) attributes {dimension_semantics = [#tpu.dimension_semantics<parallel>], iteration_bounds = array<i64: 1>, scalar_prefetch = 0 : i64, scratch_operands = 0 : i64, tpu.core_type = #tpu.core_type<tc>, window_params = [{transform_indices = @transform_0, window_bounds = array<i64: 128, 784>}, {pipeline_mode = #tpu.pipeline_mode<synchronous>, transform_indices = @transform_1, window_bounds = array<i64: 784, 512>}, {pipeline_mode = #tpu.pipeline_mode<synchronous>, transform_indices = @transform_2, window_bounds = array<i64: 1, 512>}, {pipeline_mode = #tpu.pipeline_mode<synchronous>, transform_indices = @transform_3, window_bounds = array<i64: 512, 512>}, {pipeline_mode = #tpu.pipeline_mode<synchronous>, transform_indices = @transform_4, window_bounds = array<i64: 1, 512>}, {pipeline_mode = #tpu.pipeline_mode<synchronous>, transform_indices = @transform_5, window_bounds = array<i64: 512, 128>}, {pipeline_mode = #tpu.pipeline_mode<synchronous>, transform_indices = @transform_6, window_bounds = array<i64: 1, 128>}, {transform_indices = @transform_7, window_bounds = array<i64: 128, 128>}]} {
    %c0 = arith.constant 0 : index
    %c0_0 = arith.constant 0 : index
    %0 = vector.load %arg1[%c0, %c0_0] : memref<128x784xbf16, #tpu.memory_space<vmem>>, vector<128x784xbf16>
    %c0_1 = arith.constant 0 : index
    %c0_2 = arith.constant 0 : index
    %1 = vector.load %arg2[%c0_1, %c0_2] : memref<784x512xbf16, #tpu.memory_space<vmem>>, vector<784x512xbf16>
    %cst = arith.constant dense<0.000000e+00> : vector<128x512xf32>
    %2 = tpu.matmul %0, %1, %cst {dimension_numbers = #tpu.dot_dimension_numbers<[1], [0], [0], [1], [0, 0, 1, 1], [], []>} : vector<128x784xbf16>, vector<784x512xbf16>, vector<128x512xf32> -> vector<128x512xf32>
    %c0_3 = arith.constant 0 : index
    %c0_4 = arith.constant 0 : index
    %3 = vector.load %arg3[%c0_3, %c0_4] : memref<1x512xf32, #tpu.memory_space<vmem>>, vector<1x512xf32>
    %4 = vector.broadcast %3 : vector<1x512xf32> to vector<128x512xf32>
    %5 = arith.addf %2, %4 : vector<128x512xf32>
    %cst_5 = arith.constant 0.000000e+00 : f32
    %6 = vector.broadcast %cst_5 : f32 to vector<128x512xf32>
    %7 = arith.maximumf %5, %6 : vector<128x512xf32>
    %8 = arith.truncf %7 : vector<128x512xf32> to vector<128x512xbf16>
    %c0_6 = arith.constant 0 : index
    %c0_7 = arith.constant 0 : index
    %9 = vector.load %arg4[%c0_6, %c0_7] : memref<512x512xbf16, #tpu.memory_space<vmem>>, vector<512x512xbf16>
    %cst_8 = arith.constant dense<0.000000e+00> : vector<128x512xf32>
    %10 = tpu.matmul %8, %9, %cst_8 {dimension_numbers = #tpu.dot_dimension_numbers<[1], [0], [0], [1], [0, 0, 1, 1], [], []>} : vector<128x512xbf16>, vector<512x512xbf16>, vector<128x512xf32> -> vector<128x512xf32>
    %c0_9 = arith.constant 0 : index
    %c0_10 = arith.constant 0 : index
    %11 = vector.load %arg5[%c0_9, %c0_10] : memref<1x512xf32, #tpu.memory_space<vmem>>, vector<1x512xf32>
    %12 = vector.broadcast %11 : vector<1x512xf32> to vector<128x512xf32>
    %13 = arith.addf %10, %12 : vector<128x512xf32>
    %cst_11 = arith.constant 0.000000e+00 : f32
    %14 = vector.broadcast %cst_11 : f32 to vector<128x512xf32>
    %15 = arith.maximumf %13, %14 : vector<128x512xf32>
    %16 = arith.truncf %15 : vector<128x512xf32> to vector<128x512xbf16>
    %c0_12 = arith.constant 0 : index
    %c0_13 = arith.constant 0 : index
    %17 = vector.load %arg6[%c0_12, %c0_13] : memref<512x128xbf16, #tpu.memory_space<vmem>>, vector<512x128xbf16>
    %cst_14 = arith.constant dense<0.000000e+00> : vector<128x128xf32>
    %18 = tpu.matmul %16, %17, %cst_14 {dimension_numbers = #tpu.dot_dimension_numbers<[1], [0], [0], [1], [0, 0, 1, 1], [], []>} : vector<128x512xbf16>, vector<512x128xbf16>, vector<128x128xf32> -> vector<128x128xf32>
    %c0_15 = arith.constant 0 : index
    %c0_16 = arith.constant 0 : index
    %19 = vector.load %arg7[%c0_15, %c0_16] : memref<1x128xf32, #tpu.memory_space<vmem>>, vector<1x128xf32>
    %20 = vector.broadcast %19 : vector<1x128xf32> to vector<128x128xf32>
    %21 = arith.addf %18, %20 : vector<128x128xf32>
    %22 = arith.truncf %21 : vector<128x128xf32> to vector<128x128xbf16>
    %c0_17 = arith.constant 0 : index
    %c0_18 = arith.constant 0 : index
    %23 = vector.load %arg8[%c0_17, %c0_18] : memref<128x128xbf16, #tpu.memory_space<vmem>>, vector<128x128xbf16>
    tpu.vector_store %arg8[%c0_17, %c0_18], %22 {strides = array<i32>} : memref<128x128xbf16, #tpu.memory_space<vmem>>, vector<128x128xbf16>,
    return
  }
  func.func @transform_0(%arg0: i32) -> (i32, i32) {
    %c0_i32 = arith.constant 0 : i32
    %c0_i32_0 = arith.constant 0 : i32
    return %arg0, %c0_i32 : i32, i32
  }
  func.func @transform_1(%arg0: i32) -> (i32, i32) {
    %c0_i32 = arith.constant 0 : i32
    %c0_i32_0 = arith.constant 0 : i32
    %c0_i32_1 = arith.constant 0 : i32
    return %c0_i32, %c0_i32_0 : i32, i32
  }
  func.func @transform_2(%arg0: i32) -> (i32, i32) {
    %c0_i32 = arith.constant 0 : i32
    %c0_i32_0 = arith.constant 0 : i32
    %c0_i32_1 = arith.constant 0 : i32
    return %c0_i32, %c0_i32_0 : i32, i32
  }
  func.func @transform_3(%arg0: i32) -> (i32, i32) {
    %c0_i32 = arith.constant 0 : i32
    %c0_i32_0 = arith.constant 0 : i32
    %c0_i32_1 = arith.constant 0 : i32
    return %c0_i32, %c0_i32_0 : i32, i32
  }
  func.func @transform_4(%arg0: i32) -> (i32, i32) {
    %c0_i32 = arith.constant 0 : i32
    %c0_i32_0 = arith.constant 0 : i32
    %c0_i32_1 = arith.constant 0 : i32
    return %c0_i32, %c0_i32_0 : i32, i32
  }
  func.func @transform_5(%arg0: i32) -> (i32, i32) {
    %c0_i32 = arith.constant 0 : i32
    %c0_i32_0 = arith.constant 0 : i32
    %c0_i32_1 = arith.constant 0 : i32
    return %c0_i32, %c0_i32_0 : i32, i32
  }
  func.func @transform_6(%arg0: i32) -> (i32, i32) {
    %c0_i32 = arith.constant 0 : i32
    %c0_i32_0 = arith.constant 0 : i32
    %c0_i32_1 = arith.constant 0 : i32
    return %c0_i32, %c0_i32_0 : i32, i32
  }
  func.func @transform_7(%arg0: i32) -> (i32, i32) {
    %c0_i32 = arith.constant 0 : i32
    %c0_i32_0 = arith.constant 0 : i32
    return %arg0, %c0_i32 : i32, i32
  }
}

</mosaic_0001>

<bundles_post_ra>
// kernel: tpu_custom_call.1
= control target key start
LH: loop header
LB: loop body
LE: loop exit
PB: predicated region body
PF: predicated region fallthrough
CT: control target
= control target key end

     0   :  { %12 = vsyncpa [#allocation3], 0  ;;  %s6851_s0 = inlined_call_operand.vmem [shape: bf16[128,784], index: 0, kind: input, shape index: {}]   ;;  %s6852_s1 = inlined_call_operand.hbm [shape: bf16[784,512], index: 1, kind: input, shape index: {}]   ;;  %s6853_s2 = inlined_call_operand.vmem [shape: f32[1,512], index: 2, kind: input, shape index: {}]   ;;  %s6854_s3 = inlined_call_operand.hbm [shape: bf16[512,512], index: 3, kind: input, shape index: {}]   ;;  %s6855_s4 = inlined_call_operand.vmem [shape: f32[1,512], index: 4, kind: input, shape index: {}]   ;;  %s6856_s5 = inlined_call_operand.vmem [shape: bf16[512,128], index: 5, kind: input, shape index: {}]   ;;  %s6857_s6 = inlined_call_operand.vmem [shape: f32[1,128], index: 6, kind: input, shape index: {}]   ;;  %s6858_s7 = inlined_call_operand.hbm [shape: bf16[128,128], index: 7, kind: output, shape index: {}]  }
   0x1   :  { %13 = vsyncpa [#allocation6], 0 }
   0x2   :  { %14 = vsyncpa [#allocation4], 0  ;;  %s6214_s24 = smov [#allocation2]   ;;  %s6142_s28 = scalar_lea.hbm %s6852_s1, 25088 }
   0x3   :  { %s22_s25 = sshll.u32 %s6214_s24, 4  ;;  %p6143_p0 = scmp.ne.s32.totalorder %s6852_s1, %s6142_s28  ;;  %s23_s25 = int_to_ptr.vmem [resolvable:$true] %s22_s25 }
   0x4   :  { %p6146_p1 = scmp.lt.u32.totalorder %s6142_s28, %s6852_s1 }
   0x6   :  { %p6148_p2 = pnand %p6146_p1, %p6143_p0 }
   0x8   :  { %6151 = shalt.err (!%p6148_p2)
}
   0x9   :  { %s6152_s10 = scalar_lea.vmem %s23_s25, 25088  ;;  %p6157_p4 = scmp.lt.s32.totalorder %s23_s25, %s23_s25 }
   0xa   :  { %p6153_p3 = scmp.ne.s32.totalorder %s23_s25, %s6152_s10  ;;  %p6158_p5 = scmp.lt.s32.totalorder %s6152_s10, %s6152_s10 }
   0xc   :  { %p6159_p6 = por %p6158_p5, %p6157_p4 }
   0xe   :  { %p6160_p7 = pnand %p6159_p6, %p6153_p3 }
  0x10   :  { %6163 = shalt.err (!%p6160_p7)
}
  0x11   :  { %s6215_s11 = smov 256   ;;  %s6216_s12 = smov 16  }
  0x12   :  { %28 = dma.hbm_to_vmem [thread:$0]  %s6852_s1, 25088, %s23_s25, [#allocation3], %s6215_s11, %s6215_s11, %s6216_s12  }
  0x13   :  { %s6217_s15 = smov [#allocation5]   ;;  %s6164_s19 = scalar_lea.hbm %s6854_s3, 16384 }
  0x14   :  { %s36_s16 = sshll.u32 %s6217_s15, 4  ;;  %p6165_p8 = scmp.ne.s32.totalorder %s6854_s3, %s6164_s19  ;;  %s37_s16 = int_to_ptr.vmem [resolvable:$true] %s36_s16 }
  0x15   :  { %p6168_p9 = scmp.lt.u32.totalorder %s6164_s19, %s6854_s3 }
  0x17   :  { %p6170_p10 = pnand %p6168_p9, %p6165_p8 }
  0x19   :  { %6173 = shalt.err (!%p6170_p10)
}
  0x1a   :  { %s6174_s24 = scalar_lea.vmem %s37_s16, 16384  ;;  %p6179_p12 = scmp.lt.s32.totalorder %s37_s16, %s37_s16 }
  0x1b   :  { %p6175_p11 = scmp.ne.s32.totalorder %s37_s16, %s6174_s24  ;;  %p6180_p13 = scmp.lt.s32.totalorder %s6174_s24, %s6174_s24 }
  0x1d   :  { %p6181_p0 = por %p6180_p13, %p6179_p12 }
  0x1f   :  { %p6182_p1 = pnand %p6181_p0, %p6175_p11 }
  0x21   :  { %6185 = shalt.err (!%p6182_p1)
}
  0x22   :  { %42 = dma.hbm_to_vmem [thread:$0]  %s6854_s3, 16384, %s37_s16, [#allocation6], %s6215_s11, %s6215_s11, %s6216_s12  }
  0x23   :  { %6208 = dma.done.wait [#allocation3], 25088  }
  0x24   :  { %6209 = vsyncadd [#allocation3], 4294942208 }
  0x25   :  { %6210 = dma.done.wait [#allocation6], 16384  }
  0x26   :  { %6211 = vsyncadd [#allocation6], 4294950912  ;;  %v5544_v0 = vld [vmem:[#allocation2 + $0x4] ss:$16 sps:$4 sm:$0xff]   ;;  %v5546_v1 = vld [vmem:[#allocation2 + $0xc] ss:$16 sps:$4 sm:$0xff]  }
  0x27   :  { %1623 = vmatprep.subr.bf16.mxu0 %v5544_v0  ;;  %v5548_v2 = vld [vmem:[#allocation2] ss:$16 sps:$4 sm:$0xff]   ;;  %v5549_v3 = vld [vmem:[#allocation2 + $0x8] ss:$16 sps:$4 sm:$0xff]   ;;  %2075 = vmatprep.subr.bf16.mxu1 %v5546_v1  ;;  %v5550_v4 = vld [vmem:[#allocation2 + $0x24] ss:$16 sps:$4 sm:$0xff]  }
  0x28   :  { %1624 = vmatpush1.bf16.msra.mxu0 %v5548_v2  ;;  %2076 = vmatpush1.bf16.msra.mxu1 %v5549_v3  ;;  %v5552_v5 = vld [vmem:[#allocation2 + $0x2c] ss:$16 sps:$4 sm:$0xff]   ;;  %v5554_v6 = vld [vmem:[#allocation2 + $0x20] ss:$16 sps:$4 sm:$0xff]   ;;  %v5555_v7 = vld [vmem:[#allocation2 + $0x28] ss:$16 sps:$4 sm:$0xff]  }
  0x29   :  { %1625 = vmatprep.subr.bf16.mxu0 %v5550_v4  ;;  %2077 = vmatprep.subr.bf16.mxu1 %v5552_v5  ;;  %v5556_v8 = vld [vmem:[#allocation2 + $0x44] ss:$16 sps:$4 sm:$0xff]   ;;  %v5558_v9 = vld [vmem:[#allocation2 + $0x4c] ss:$16 sps:$4 sm:$0xff]   ;;  %v5560_v10 = vld [vmem:[#allocation2 + $0x40] ss:$16 sps:$4 sm:$0xff]  }
  0x2a   :  { %v5561_v11 = vld [vmem:[#allocation2 + $0x48] ss:$16 sps:$4 sm:$0xff]   ;;  %v5562_v12 = vld [vmem:[#allocation2 + $0x64] ss:$16 sps:$4 sm:$0xff]   ;;  %v5564_v13 = vld [vmem:[#allocation2 + $0x6c] ss:$16 sps:$4 sm:$0xff]  }
  0x2b   :  { %v5566_v14 = vld [vmem:[#allocation2 + $0x60] ss:$16 sps:$4 sm:$0xff]   ;;  %v5567_v15 = vld [vmem:[#allocation2 + $0x68] ss:$16 sps:$4 sm:$0xff]   ;;  %v5568_v16 = vld [vmem:[#allocation2 + $0x84] ss:$16 sps:$4 sm:$0xff]  }
  0x2c   :  { %1626 = vmatpush1.bf16.msra.mxu0 %v5554_v6  ;;  %2078 = vmatpush1.bf16.msra.mxu1 %v5555_v7  ;;  %v5570_v17 = vld [vmem:[#allocation2 + $0x8c] ss:$16 sps:$4 sm:$0xff]   ;;  %v5572_v18 = vld [vmem:[#allocation2 + $0x80] ss:$16 sps:$4 sm:$0xff]   ;;  %v5573_v19 = vld [vmem:[#allocation2 + $0x88] ss:$16 sps:$4 sm:$0xff]  }
  0x2d   :  { %1627 = vmatprep.subr.bf16.mxu0 %v5556_v8  ;;  %2079 = vmatprep.subr.bf16.mxu1 %v5558_v9  ;;  %v5574_v20 = vld [vmem:[#allocation2 + $0xa4] ss:$16 sps:$4 sm:$0xff]   ;;  %v5576_v21 = vld [vmem:[#allocation2 + $0xac] ss:$16 sps:$4 sm:$0xff]   ;;  %v5578_v22 = vld [vmem:[#allocation2 + $0xa0] ss:$16 sps:$4 sm:$0xff]  }
  0x2e   :  { %v5579_v23 = vld [vmem:[#allocation2 + $0xa8] ss:$16 sps:$4 sm:$0xff]   ;;  %v5580_v24 = vld [vmem:[#allocation2 + $0xc4] ss:$16 sps:$4 sm:$0xff]   ;;  %v5582_v25 = vld [vmem:[#allocation2 + $0xcc] ss:$16 sps:$4 sm:$0xff]  }
  0x2f   :  { %v5584_v26 = vld [vmem:[#allocation2 + $0xc0] ss:$16 sps:$4 sm:$0xff]   ;;  %v5585_v27 = vld [vmem:[#allocation2 + $0xc8] ss:$16 sps:$4 sm:$0xff]   ;;  %v5586_v28 = vld [vmem:[#allocation2 + $0xe4] ss:$16 sps:$4 sm:$0xff]  }
  0x30   :  { %1628 = vmatpush1.bf16.msra.mxu0 %v5560_v10  ;;  %2080 = vmatpush1.bf16.msra.mxu1 %v5561_v11  ;;  %v5588_v29 = vld [vmem:[#allocation2 + $0xec] ss:$16 sps:$4 sm:$0xff]   ;;  %v5590_v30 = vld [vmem:[#allocation2 + $0xe0] ss:$16 sps:$4 sm:$0xff]   ;;  %v5591_v31 = vld [vmem:[#allocation2 + $0xe8] ss:$16 sps:$4 sm:$0xff]  }
  0x31   :  { %1629 = vmatprep.subr.bf16.mxu0 %v5562_v12  ;;  %2081 = vmatprep.subr.bf16.mxu1 %v5564_v13  ;;  %v5592_v32 = vld [vmem:[#allocation2 + $0x104] ss:$16 sps:$4 sm:$0xff]   ;;  %v5594_v33 = vld [vmem:[#allocation2 + $0x10c] ss:$16 sps:$4 sm:$0xff]   ;;  %v5596_v34 = vld [vmem:[#allocation2 + $0x100] ss:$16 sps:$4 sm:$0xff]  }
  0x32   :  { %v5597_v35 = vld [vmem:[#allocation2 + $0x108] ss:$16 sps:$4 sm:$0xff]   ;;  %v5598_v36 = vld [vmem:[#allocation2 + $0x124] ss:$16 sps:$4 sm:$0xff]   ;;  %v5600_v37 = vld [vmem:[#allocation2 + $0x12c] ss:$16 sps:$4 sm:$0xff]  }
  0x33   :  { %v5602_v38 = vld [vmem:[#allocation2 + $0x120] ss:$16 sps:$4 sm:$0xff]   ;;  %v5603_v39 = vld [vmem:[#allocation2 + $0x128] ss:$16 sps:$4 sm:$0xff]   ;;  %v5604_v40 = vld [vmem:[#allocation2 + $0x144] ss:$16 sps:$4 sm:$0xff]  }
  0x34   :  { %1630 = vmatpush1.bf16.msra.mxu0 %v5566_v14  ;;  %2082 = vmatpush1.bf16.msra.mxu1 %v5567_v15  ;;  %v5606_v41 = vld [vmem:[#allocation2 + $0x14c] ss:$16 sps:$4 sm:$0xff]   ;;  %v5608_v42 = vld [vmem:[#allocation2 + $0x140] ss:$16 sps:$4 sm:$0xff]   ;;  %v5609_v43 = vld [vmem:[#allocation2 + $0x148] ss:$16 sps:$4 sm:$0xff]  }
  0x35   :  { %1631 = vmatprep.subr.bf16.mxu0 %v5568_v16  ;;  %2083 = vmatprep.subr.bf16.mxu1 %v5570_v17  ;;  %v5610_v44 = vld [vmem:[#allocation2 + $0x164] ss:$16 sps:$4 sm:$0xff]   ;;  %v5612_v45 = vld [vmem:[#allocation2 + $0x16c] ss:$16 sps:$4 sm:$0xff]   ;;  %v5614_v46 = vld [vmem:[#allocation2 + $0x160] ss:$16 sps:$4 sm:$0xff]  }
  0x36   :  { %v5615_v47 = vld [vmem:[#allocation2 + $0x168] ss:$16 sps:$4 sm:$0xff]   ;;  %v5642_v48 = vld [vmem:[%s6851_s0 + $0x4] ss:$28 sps:$4 sm:$0xff]   ;;  %v5618_v50 = vld [vmem:[#allocation2 + $0x18c] ss:$16 sps:$4 sm:$0xff]  }
  0x37   :  { %v5616_v49 = vld [vmem:[#allocation2 + $0x184] ss:$16 sps:$4 sm:$0xff]   ;;  %1655 = vmatprep.mubr.bf16.mxu0 %v5642_v48  ;;  %2107 = vmatprep.mubr.bf16.mxu1 %v5642_v48  ;;  %v5620_v51 = vld [vmem:[#allocation2 + $0x180] ss:$16 sps:$4 sm:$0xff]   ;;  %v5621_v52 = vld [vmem:[#allocation2 + $0x188] ss:$16 sps:$4 sm:$0xff]  }
  0x38   :  { %1632 = vmatpush1.bf16.msra.mxu0 %v5572_v18  ;;  %2084 = vmatpush1.bf16.msra.mxu1 %v5573_v19  ;;  %v5622_v53 = vld [vmem:[#allocation2 + $0x1a4] ss:$16 sps:$4 sm:$0xff]   ;;  %v5624_v54 = vld [vmem:[#allocation2 + $0x1ac] ss:$16 sps:$4 sm:$0xff]   ;;  %v5626_v55 = vld [vmem:[#allocation2 + $0x1a0] ss:$16 sps:$4 sm:$0xff]  }
  0x39   :  { %1633 = vmatprep.subr.bf16.mxu0 %v5574_v20  ;;  %2085 = vmatprep.subr.bf16.mxu1 %v5576_v21  ;;  %v5627_v56 = vld [vmem:[#allocation2 + $0x1a8] ss:$16 sps:$4 sm:$0xff]   ;;  %v5628_v57 = vld [vmem:[#allocation2 + $0x1c4] ss:$16 sps:$4 sm:$0xff]   ;;  %v5630_v58 = vld [vmem:[#allocation2 + $0x1cc] ss:$16 sps:$4 sm:$0xff]  }
  0x3a   :  { %v5632_v59 = vld [vmem:[#allocation2 + $0x1c0] ss:$16 sps:$4 sm:$0xff]   ;;  %v5633_v60 = vld [vmem:[#allocation2 + $0x1c8] ss:$16 sps:$4 sm:$0xff]   ;;  %v5634_v61 = vld [vmem:[#allocation2 + $0x1e4] ss:$16 sps:$4 sm:$0xff]  }
  0x3b   :  { %v5636_v62 = vld [vmem:[#allocation2 + $0x1ec] ss:$16 sps:$4 sm:$0xff]   ;;  %v5638_v63 = vld [vmem:[#allocation2 + $0x1e0] ss:$16 sps:$4 sm:$0xff]   ;;  %v5639_v0 = vld [vmem:[#allocation2 + $0x1e8] ss:$16 sps:$4 sm:$0xff]  }
  0x3c   :  { %1634 = vmatpush1.bf16.msra.mxu0 %v5578_v22  ;;  %2086 = vmatpush1.bf16.msra.mxu1 %v5579_v23  ;;  %v5645_v1 = vld [vmem:[#allocation2 + $0x204] ss:$16 sps:$4 sm:$0xff]   ;;  %v5648_v2 = vld [vmem:[#allocation2 + $0x20c] ss:$16 sps:$4 sm:$0xff]   ;;  %v5643_v4 = vld [vmem:[#allocation2 + $0x200] ss:$16 sps:$4 sm:$0xff]  }
  0x3d   :  { %1635 = vmatprep.subr.bf16.mxu0 %v5580_v24  ;;  %2087 = vmatprep.subr.bf16.mxu1 %v5582_v25  ;;  %v5640_v3 = vld [vmem:[%s6851_s0] ss:$28 sps:$4 sm:$0xff]   ;;  %v5646_v5 = vld [vmem:[#allocation2 + $0x208] ss:$16 sps:$4 sm:$0xff]   ;;  %v5651_v6 = vld [vmem:[#allocation2 + $0x224] ss:$16 sps:$4 sm:$0xff]  }
  0x3e   :  { %v5654_v7 = vld [vmem:[#allocation2 + $0x22c] ss:$16 sps:$4 sm:$0xff]   ;;  %v5649_v9 = vld [vmem:[#allocation2 + $0x220] ss:$16 sps:$4 sm:$0xff]   ;;  %v5652_v10 = vld [vmem:[#allocation2 + $0x228] ss:$16 sps:$4 sm:$0xff]  }
  0x3f   :  { %v5655_v8 = vld [vmem:[%s6851_s0 + $0x3c] ss:$28 sps:$4 sm:$0xff]   ;;  %v5660_v11 = vld [vmem:[#allocation2 + $0x244] ss:$16 sps:$4 sm:$0xff]   ;;  %v5658_v14 = vld [vmem:[#allocation2 + $0x240] ss:$16 sps:$4 sm:$0xff]  }
  0x40   :  { %1636 = vmatpush1.bf16.msra.mxu0 %v5584_v26  ;;  %2088 = vmatpush1.bf16.msra.mxu1 %v5585_v27  ;;  %v5663_v12 = vld [vmem:[#allocation2 + $0x24c] ss:$16 sps:$4 sm:$0xff]   ;;  %v5657_v13 = vld [vmem:[%s6851_s0 + $0x38] ss:$28 sps:$4 sm:$0xff]   ;;  %v5664_v19 = vld [vmem:[#allocation2 + $0x260] ss:$16 sps:$4 sm:$0xff]  }
  0x41   :  { %1637 = vmatprep.subr.bf16.mxu0 %v5586_v28  ;;  %2089 = vmatprep.subr.bf16.mxu1 %v5588_v29  ;;  %v5661_v15 = vld [vmem:[#allocation2 + $0x248] ss:$16 sps:$4 sm:$0xff]   ;;  %v5666_v16 = vld [vmem:[#allocation2 + $0x264] ss:$16 sps:$4 sm:$0xff]   ;;  %v5669_v17 = vld [vmem:[#allocation2 + $0x26c] ss:$16 sps:$4 sm:$0xff]  }
  0x42   :  { %v5670_v18 = vld [vmem:[%s6851_s0 + $0x74] ss:$28 sps:$4 sm:$0xff]   ;;  %v5667_v20 = vld [vmem:[#allocation2 + $0x268] ss:$16 sps:$4 sm:$0xff]   ;;  %v5678_v22 = vld [vmem:[#allocation2 + $0x28c] ss:$16 sps:$4 sm:$0xff]  }
  0x43   :  { %v5675_v21 = vld [vmem:[#allocation2 + $0x284] ss:$16 sps:$4 sm:$0xff]   ;;  %v5672_v23 = vld [vmem:[%s6851_s0 + $0x70] ss:$28 sps:$4 sm:$0xff]   ;;  %v5676_v25 = vld [vmem:[#allocation2 + $0x288] ss:$16 sps:$4 sm:$0xff]  }
  0x44   :  { %1638 = vmatpush1.bf16.msra.mxu0 %v5590_v30  ;;  %2090 = vmatpush1.bf16.msra.mxu1 %v5591_v31  ;;  %v5673_v24 = vld [vmem:[#allocation2 + $0x280] ss:$16 sps:$4 sm:$0xff]   ;;  %v5681_v26 = vld [vmem:[#allocation2 + $0x2a4] ss:$16 sps:$4 sm:$0xff]   ;;  %v5684_v27 = vld [vmem:[#allocation2 + $0x2ac] ss:$16 sps:$4 sm:$0xff]  }
  0x45   :  { %1639 = vmatprep.subr.bf16.mxu0 %v5592_v32  ;;  %2091 = vmatprep.subr.bf16.mxu1 %v5594_v33  ;;  %v5685_v28 = vld [vmem:[%s6851_s0 + $0xac] ss:$28 sps:$4 sm:$0xff]   ;;  %v5679_v29 = vld [vmem:[#allocation2 + $0x2a0] ss:$16 sps:$4 sm:$0xff]   ;;  %v5690_v31 = vld [vmem:[#allocation2 + $0x2c4] ss:$16 sps:$4 sm:$0xff]  }
  0x46   :  { %v5682_v30 = vld [vmem:[#allocation2 + $0x2a8] ss:$16 sps:$4 sm:$0xff]   ;;  %v5693_v32 = vld [vmem:[#allocation2 + $0x2cc] ss:$16 sps:$4 sm:$0xff]   ;;  %vm1598_vm0 = vcmask 130048  }
  0x47   :  { %v5687_v33 = vld [vmem:[%s6851_s0 + $0xa8] ss:$28 sps:$4 sm:$0xff]   ;;  %v5715_v48 = vld [vmem:[%s6851_s0 + $0x11c] ss:$28 sps:$4 sm:$0xff]  }
  0x48   :  { %1640 = vmatpush1.bf16.msra.mxu0 %v5596_v34  ;;  %2092 = vmatpush1.bf16.msra.mxu1 %v5597_v35  ;;  %v5688_v34 = vld [vmem:[#allocation2 + $0x2c0] ss:$16 sps:$4 sm:$0xff]   ;;  %v5691_v35 = vld [vmem:[#allocation2 + $0x2c8] ss:$16 sps:$4 sm:$0xff]  }
  0x49   :  { %1641 = vmatprep.subr.bf16.mxu0 %v5598_v36  ;;  %2093 = vmatprep.subr.bf16.mxu1 %v5600_v37  ;;  %v5696_v36 = vld [vmem:[#allocation2 + $0x2e4] ss:$16 sps:$4 sm:$0xff]   ;;  %v5699_v37 = vld [vmem:[#allocation2 + $0x2ec] ss:$16 sps:$4 sm:$0xff]  }
  0x4c   :  { %1642 = vmatpush1.bf16.msra.mxu0 %v5602_v38  ;;  %2094 = vmatpush1.bf16.msra.mxu1 %v5603_v39  ;;  %v5700_v38 = vld [vmem:[%s6851_s0 + $0xe4] ss:$28 sps:$4 sm:$0xff]  }
  0x4d   :  { %1643 = vmatprep.subr.bf16.mxu0 %v5604_v40  ;;  %2095 = vmatprep.subr.bf16.mxu1 %v5606_v41  ;;  %v5694_v39 = vld [vmem:[#allocation2 + $0x2e0] ss:$16 sps:$4 sm:$0xff]   ;;  %v5697_v40 = vld [vmem:[#allocation2 + $0x2e8] ss:$16 sps:$4 sm:$0xff]   ;;  %v5705_v41 = vld [vmem:[#allocation2 + $0x304] ss:$16 sps:$4 sm:$0xff]  }
  0x50   :  { %1644 = vmatpush1.bf16.msra.mxu0 %v5608_v42  ;;  %2096 = vmatpush1.bf16.msra.mxu1 %v5609_v43  ;;  %v5708_v42 = vld [vmem:[#allocation2 + $0x30c] ss:$16 sps:$4 sm:$0xff]  }
  0x51   :  { %1645 = vmatprep.subr.bf16.mxu0 %v5610_v44  ;;  %2097 = vmatprep.subr.bf16.mxu1 %v5612_v45  ;;  %v5702_v43 = vld [vmem:[%s6851_s0 + $0xe0] ss:$28 sps:$4 sm:$0xff]   ;;  %v5706_v45 = vld [vmem:[#allocation2 + $0x308] ss:$16 sps:$4 sm:$0xff]  }
  0x52   :  { %v5703_v44 = vld [vmem:[#allocation2 + $0x300] ss:$16 sps:$4 sm:$0xff]  }
  0x54   :  { %1646 = vmatpush1.bf16.msra.mxu0 %v5614_v46  ;;  %2098 = vmatpush1.bf16.msra.mxu1 %v5615_v47  ;;  %v5711_v46 = vld [vmem:[#allocation2 + $0x324] ss:$16 sps:$4 sm:$0xff]   ;;  %v5714_v47 = vld [vmem:[#allocation2 + $0x32c] ss:$16 sps:$4 sm:$0xff]  }
  0x55   :  { %1647 = vmatprep.subr.bf16.mxu0 %v5616_v49  ;;  %2099 = vmatprep.subr.bf16.mxu1 %v5618_v50  ;;  %v5709_v49 = vld [vmem:[#allocation2 + $0x320] ss:$16 sps:$4 sm:$0xff]   ;;  %v5712_v50 = vld [vmem:[#allocation2 + $0x328] ss:$16 sps:$4 sm:$0xff]  }
  0x58   :  { %1648 = vmatpush1.bf16.msra.mxu0 %v5620_v51  ;;  %2100 = vmatpush1.bf16.msra.mxu1 %v5621_v52  ;;  %v5720_v51 = vld [vmem:[#allocation2 + $0x344] ss:$16 sps:$4 sm:$0xff]   ;;  %v5723_v52 = vld [vmem:[#allocation2 + $0x34c] ss:$16 sps:$4 sm:$0xff]  }
  0x59   :  { %1649 = vmatprep.subr.bf16.mxu0 %v5622_v53  ;;  %2101 = vmatprep.subr.bf16.mxu1 %v5624_v54  ;;  %v5717_v53 = vld [vmem:[%s6851_s0 + $0x118] ss:$28 sps:$4 sm:$0xff]   ;;  %v5718_v54 = vld [vmem:[#allocation2 + $0x340] ss:$16 sps:$4 sm:$0xff]  }
  0x5c   :  { %1650 = vmatpush1.bf16.msra.mxu0 %v5626_v55  ;;  %2102 = vmatpush1.bf16.msra.mxu1 %v5627_v56  ;;  %v5721_v55 = vld [vmem:[#allocation2 + $0x348] ss:$16 sps:$4 sm:$0xff]   ;;  %v5726_v56 = vld [vmem:[#allocation2 + $0x364] ss:$16 sps:$4 sm:$0xff]  }
  0x5d   :  { %1651 = vmatprep.subr.bf16.mxu0 %v5628_v57  ;;  %2103 = vmatprep.subr.bf16.mxu1 %v5630_v58  ;;  %v5729_v57 = vld [vmem:[#allocation2 + $0x36c] ss:$16 sps:$4 sm:$0xff]   ;;  %v5730_v58 = vld [vmem:[%s6851_s0 + $0x154] ss:$28 sps:$4 sm:$0xff]  }
  0x60   :  { %1652 = vmatpush1.bf16.msra.mxu0 %v5632_v59  ;;  %2104 = vmatpush1.bf16.msra.mxu1 %v5633_v60  ;;  %v5724_v59 = vld [vmem:[#allocation2 + $0x360] ss:$16 sps:$4 sm:$0xff]   ;;  %v5727_v60 = vld [vmem:[#allocation2 + $0x368] ss:$16 sps:$4 sm:$0xff]  }
  0x61   :  { %1653 = vmatprep.subr.bf16.mxu0 %v5634_v61  ;;  %2105 = vmatprep.subr.bf16.mxu1 %v5636_v62  ;;  %v5735_v61 = vld [vmem:[#allocation2 + $0x384] ss:$16 sps:$4 sm:$0xff]   ;;  %v5738_v62 = vld [vmem:[#allocation2 + $0x38c] ss:$16 sps:$4 sm:$0xff]  }
  0x64   :  { %1654 = vmatpush1.bf16.msra.mxu0 %v5638_v63  ;;  %2106 = vmatpush1.bf16.msra.mxu1 %v5639_v0  ;;  %v5732_v63 = vld [vmem:[%s6851_s0 + $0x150] ss:$28 sps:$4 sm:$0xff]  }
  0x65   :  { %1736 = vmatprep.subr.bf16.mxu0 %v5645_v1  ;;  %2188 = vmatprep.subr.bf16.mxu1 %v5648_v2  ;;  %v5733_v0 = vld [vmem:[#allocation2 + $0x380] ss:$16 sps:$4 sm:$0xff]   ;;  %v5736_v1 = vld [vmem:[#allocation2 + $0x388] ss:$16 sps:$4 sm:$0xff]   ;;  %v5741_v2 = vld [vmem:[#allocation2 + $0x3a4] ss:$16 sps:$4 sm:$0xff]  }
  0x67   :  { %1656 = vmatmul.mubr.bf16.vlgmr.msra.gmra.mrb[0].mxu0 %v5640_v3  ;;  %2108 = vmatmul.mubr.bf16.vlgmr.msra.gmra.mrb[0].mxu1 %v5640_v3  ;;  %v5744_v3 = vld [vmem:[#allocation2 + $0x3ac] ss:$16 sps:$4 sm:$0xff]  }
  0x68   :  { %1737 = vmatpush1.bf16.msra.mxu0 %v5643_v4  ;;  %2189 = vmatpush1.bf16.msra.mxu1 %v5646_v5  ;;  %v5745_v4 = vld [vmem:[%s6851_s0 + $0x18c] ss:$28 sps:$4 sm:$0xff]   ;;  %v5739_v5 = vld [vmem:[#allocation2 + $0x3a0] ss:$16 sps:$4 sm:$0xff]  }
  0x69   :  { %1738 = vmatprep.subr.bf16.mxu0 %v5651_v6  ;;  %2190 = vmatprep.subr.bf16.mxu1 %v5654_v7  ;;  %v5742_v6 = vld [vmem:[#allocation2 + $0x3a8] ss:$16 sps:$4 sm:$0xff]   ;;  %v5750_v7 = vld [vmem:[#allocation2 + $0x3c4] ss:$16 sps:$4 sm:$0xff]  }
  0x6a   :  { %1665 = vmatprep.mubr.bf16.mxu0 %v5655_v8  ;;  %2117 = vmatprep.mubr.bf16.mxu1 %v5655_v8  ;;  %v5753_v8 = vld [vmem:[#allocation2 + $0x3cc] ss:$16 sps:$4 sm:$0xff]  }
  0x6c   :  { %1739 = vmatpush1.bf16.msra.mxu0 %v5649_v9  ;;  %2191 = vmatpush1.bf16.msra.mxu1 %v5652_v10  ;;  %v5747_v9 = vld [vmem:[%s6851_s0 + $0x188] ss:$28 sps:$4 sm:$0xff]   ;;  %v5748_v10 = vld [vmem:[#allocation2 + $0x3c0] ss:$16 sps:$4 sm:$0xff]  }
  0x6d   :  { %1740 = vmatprep.subr.bf16.mxu0 %v5660_v11  ;;  %2192 = vmatprep.subr.bf16.mxu1 %v5663_v12  ;;  %v5751_v11 = vld [vmem:[#allocation2 + $0x3c8] ss:$16 sps:$4 sm:$0xff]   ;;  %v5756_v12 = vld [vmem:[#allocation2 + $0x3e4] ss:$16 sps:$4 sm:$0xff]  }
  0x6f   :  { %1666 = vmatmul.mubr.bf16.gmra.mrb[4].mxu0 %v5657_v13  ;;  %2118 = vmatmul.mubr.bf16.gmra.mrb[4].mxu1 %v5657_v13  ;;  %v5759_v13 = vld [vmem:[#allocation2 + $0x3ec] ss:$16 sps:$4 sm:$0xff]  }
  0x70   :  { %1741 = vmatpush1.bf16.msra.mxu0 %v5658_v14  ;;  %2193 = vmatpush1.bf16.msra.mxu1 %v5661_v15  ;;  %v5762_v14 = vld [vmem:[%s6851_s0 + $0xc] ss:$28 sps:$4 sm:$0xff]   ;;  %v5754_v15 = vld [vmem:[#allocation2 + $0x3e0] ss:$16 sps:$4 sm:$0xff]  }
  0x71   :  { %1742 = vmatprep.subr.bf16.mxu0 %v5666_v16  ;;  %2194 = vmatprep.subr.bf16.mxu1 %v5669_v17  ;;  %v5757_v16 = vld [vmem:[#allocation2 + $0x3e8] ss:$16 sps:$4 sm:$0xff]   ;;  %v5765_v17 = vld [vmem:[#allocation2 + $0x404] ss:$16 sps:$4 sm:$0xff]  }
  0x72   :  { %1675 = vmatprep.mubr.bf16.mxu0 %v5670_v18  ;;  %2127 = vmatprep.mubr.bf16.mxu1 %v5670_v18  ;;  %v5768_v18 = vld [vmem:[#allocation2 + $0x40c] ss:$16 sps:$4 sm:$0xff]  }
  0x74   :  { %1743 = vmatpush1.bf16.msra.mxu0 %v5664_v19  ;;  %2195 = vmatpush1.bf16.msra.mxu1 %v5667_v20  ;;  %v5760_v19 = vld [vmem:[%s6851_s0 + $0x8] ss:$28 sps:$4 sm:$0xff]   ;;  %v5763_v20 = vld [vmem:[#allocation2 + $0x400] ss:$16 sps:$4 sm:$0xff]  }
  0x75   :  { %1744 = vmatprep.subr.bf16.mxu0 %v5675_v21  ;;  %2196 = vmatprep.subr.bf16.mxu1 %v5678_v22  ;;  %v5766_v21 = vld [vmem:[#allocation2 + $0x408] ss:$16 sps:$4 sm:$0xff]   ;;  %v5771_v22 = vld [vmem:[#allocation2 + $0x424] ss:$16 sps:$4 sm:$0xff]  }
  0x77   :  { %1676 = vmatmul.mubr.bf16.gmra.mrb[8].mxu0 %v5672_v23  ;;  %2128 = vmatmul.mubr.bf16.gmra.mrb[8].mxu1 %v5672_v23  ;;  %v5774_v23 = vld [vmem:[#allocation2 + $0x42c] ss:$16 sps:$4 sm:$0xff]  }
  0x78   :  { %1745 = vmatpush1.bf16.msra.mxu0 %v5673_v24  ;;  %2197 = vmatpush1.bf16.msra.mxu1 %v5676_v25  ;;  %v5775_v24 = vld [vmem:[%s6851_s0 + $0x44] ss:$28 sps:$4 sm:$0xff]  }
  0x79   :  { %1746 = vmatprep.subr.bf16.mxu0 %v5681_v26  ;;  %2198 = vmatprep.subr.bf16.mxu1 %v5684_v27  ;;  %v5769_v25 = vld [vmem:[#allocation2 + $0x420] ss:$16 sps:$4 sm:$0xff]   ;;  %v5772_v26 = vld [vmem:[#allocation2 + $0x428] ss:$16 sps:$4 sm:$0xff]   ;;  %v5780_v27 = vld [vmem:[#allocation2 + $0x444] ss:$16 sps:$4 sm:$0xff]  }
  0x7a   :  { %1685 = vmatprep.mubr.bf16.mxu0 %v5685_v28  ;;  %2137 = vmatprep.mubr.bf16.mxu1 %v5685_v28  ;;  %v5783_v28 = vld [vmem:[#allocation2 + $0x44c] ss:$16 sps:$4 sm:$0xff]  }
  0x7c   :  { %1747 = vmatpush1.bf16.msra.mxu0 %v5679_v29  ;;  %2199 = vmatpush1.bf16.msra.mxu1 %v5682_v30  ;;  %v5777_v29 = vld [vmem:[%s6851_s0 + $0x40] ss:$28 sps:$4 sm:$0xff]  }
  0x7d   :  { %1748 = vmatprep.subr.bf16.mxu0 %v5690_v31  ;;  %2200 = vmatprep.subr.bf16.mxu1 %v5693_v32  ;;  %v5778_v30 = vld [vmem:[#allocation2 + $0x440] ss:$16 sps:$4 sm:$0xff]   ;;  %v5781_v31 = vld [vmem:[#allocation2 + $0x448] ss:$16 sps:$4 sm:$0xff]   ;;  %v5786_v32 = vld [vmem:[#allocation2 + $0x464] ss:$16 sps:$4 sm:$0xff]  }
  0x7f   :  { %1686 = vmatmul.mubr.bf16.gmra.mrb[12].mxu0 %v5687_v33  ;;  %2138 = vmatmul.mubr.bf16.gmra.mrb[12].mxu1 %v5687_v33  ;;  %v5789_v33 = vld [vmem:[#allocation2 + $0x46c] ss:$16 sps:$4 sm:$0xff]  }
  0x80   :  { %1749 = vmatpush1.bf16.msra.mxu0 %v5688_v34  ;;  %2201 = vmatpush1.bf16.msra.mxu1 %v5691_v35  ;;  %v5790_v34 = vld [vmem:[%s6851_s0 + $0x7c] ss:$28 sps:$4 sm:$0xff]   ;;  %v5784_v35 = vld [vmem:[#allocation2 + $0x460] ss:$16 sps:$4 sm:$0xff]  }
  0x81   :  { %1750 = vmatprep.subr.bf16.mxu0 %v5696_v36  ;;  %2202 = vmatprep.subr.bf16.mxu1 %v5699_v37  ;;  %v5787_v36 = vld [vmem:[#allocation2 + $0x468] ss:$16 sps:$4 sm:$0xff]   ;;  %v5795_v37 = vld [vmem:[#allocation2 + $0x484] ss:$16 sps:$4 sm:$0xff]  }
  0x82   :  { %1695 = vmatprep.mubr.bf16.mxu0 %v5700_v38  ;;  %2147 = vmatprep.mubr.bf16.mxu1 %v5700_v38  ;;  %v5798_v38 = vld [vmem:[#allocation2 + $0x48c] ss:$16 sps:$4 sm:$0xff]  }
  0x84   :  { %1751 = vmatpush1.bf16.msra.mxu0 %v5694_v39  ;;  %2203 = vmatpush1.bf16.msra.mxu1 %v5697_v40  ;;  %v5792_v39 = vld [vmem:[%s6851_s0 + $0x78] ss:$28 sps:$4 sm:$0xff]   ;;  %v5793_v40 = vld [vmem:[#allocation2 + $0x480] ss:$16 sps:$4 sm:$0xff]  }
  0x85   :  { %1752 = vmatprep.subr.bf16.mxu0 %v5705_v41  ;;  %2204 = vmatprep.subr.bf16.mxu1 %v5708_v42  ;;  %v5796_v41 = vld [vmem:[#allocation2 + $0x488] ss:$16 sps:$4 sm:$0xff]   ;;  %v5801_v42 = vld [vmem:[#allocation2 + $0x4a4] ss:$16 sps:$4 sm:$0xff]  }
  0x87   :  { %1696 = vmatmul.mubr.bf16.gmra.mrb[16].mxu0 %v5702_v43  ;;  %2148 = vmatmul.mubr.bf16.gmra.mrb[16].mxu1 %v5702_v43  ;;  %v5804_v43 = vld [vmem:[#allocation2 + $0x4ac] ss:$16 sps:$4 sm:$0xff]  }
  0x88   :  { %1753 = vmatpush1.bf16.msra.mxu0 %v5703_v44  ;;  %2205 = vmatpush1.bf16.msra.mxu1 %v5706_v45  ;;  %v5805_v44 = vld [vmem:[%s6851_s0 + $0xb4] ss:$28 sps:$4 sm:$0xff]  }
  0x89   :  { %1754 = vmatprep.subr.bf16.mxu0 %v5711_v46  ;;  %2206 = vmatprep.subr.bf16.mxu1 %v5714_v47  ;;  %v5799_v45 = vld [vmem:[#allocation2 + $0x4a0] ss:$16 sps:$4 sm:$0xff]   ;;  %v5802_v46 = vld [vmem:[#allocation2 + $0x4a8] ss:$16 sps:$4 sm:$0xff]   ;;  %v5810_v47 = vld [vmem:[#allocation2 + $0x4c4] ss:$16 sps:$4 sm:$0xff]  }
  0x8a   :  { %1705 = vmatprep.mubr.bf16.mxu0 %v5715_v48  ;;  %2157 = vmatprep.mubr.bf16.mxu1 %v5715_v48  ;;  %v5813_v48 = vld [vmem:[#allocation2 + $0x4cc] ss:$16 sps:$4 sm:$0xff]  }
  0x8c   :  { %1755 = vmatpush1.bf16.msra.mxu0 %v5709_v49  ;;  %2207 = vmatpush1.bf16.msra.mxu1 %v5712_v50  ;;  %v5807_v49 = vld [vmem:[%s6851_s0 + $0xb0] ss:$28 sps:$4 sm:$0xff]  }
  0x8d   :  { %1756 = vmatprep.subr.bf16.mxu0 %v5720_v51  ;;  %2208 = vmatprep.subr.bf16.mxu1 %v5723_v52  ;;  %v5808_v50 = vld [vmem:[#allocation2 + $0x4c0] ss:$16 sps:$4 sm:$0xff]   ;;  %v5811_v51 = vld [vmem:[#allocation2 + $0x4c8] ss:$16 sps:$4 sm:$0xff]   ;;  %v5816_v52 = vld [vmem:[#allocation2 + $0x4e4] ss:$16 sps:$4 sm:$0xff]  }
  0x8f   :  { %1706 = vmatmul.mubr.bf16.gmra.mrb[20].mxu0 %v5717_v53  ;;  %2158 = vmatmul.mubr.bf16.gmra.mrb[20].mxu1 %v5717_v53  ;;  %v5819_v53 = vld [vmem:[#allocation2 + $0x4ec] ss:$16 sps:$4 sm:$0xff]  }
  0x90   :  { %1757 = vmatpush1.bf16.msra.mxu0 %v5718_v54  ;;  %2209 = vmatpush1.bf16.msra.mxu1 %v5721_v55  ;;  %v5820_v54 = vld [vmem:[%s6851_s0 + $0xec] ss:$28 sps:$4 sm:$0xff]   ;;  %v5814_v55 = vld [vmem:[#allocation2 + $0x4e0] ss:$16 sps:$4 sm:$0xff]  }
  0x91   :  { %1758 = vmatprep.subr.bf16.mxu0 %v5726_v56  ;;  %2210 = vmatprep.subr.bf16.mxu1 %v5729_v57  ;;  %v5817_v56 = vld [vmem:[#allocation2 + $0x4e8] ss:$16 sps:$4 sm:$0xff]   ;;  %v5825_v57 = vld [vmem:[#allocation2 + $0x504] ss:$16 sps:$4 sm:$0xff]  }
  0x92   :  { %1715 = vmatprep.mubr.bf16.mxu0 %v5730_v58  ;;  %2167 = vmatprep.mubr.bf16.mxu1 %v5730_v58  ;;  %v5828_v58 = vld [vmem:[#allocation2 + $0x50c] ss:$16 sps:$4 sm:$0xff]  }
  0x94   :  { %1759 = vmatpush1.bf16.msra.mxu0 %v5724_v59  ;;  %2211 = vmatpush1.bf16.msra.mxu1 %v5727_v60  ;;  %v5822_v59 = vld [vmem:[%s6851_s0 + $0xe8] ss:$28 sps:$4 sm:$0xff]   ;;  %v5823_v60 = vld [vmem:[#allocation2 + $0x500] ss:$16 sps:$4 sm:$0xff]  }
  0x95   :  { %1760 = vmatprep.subr.bf16.mxu0 %v5735_v61  ;;  %2212 = vmatprep.subr.bf16.mxu1 %v5738_v62  ;;  %v5826_v61 = vld [vmem:[#allocation2 + $0x508] ss:$16 sps:$4 sm:$0xff]   ;;  %v5831_v62 = vld [vmem:[#allocation2 + $0x524] ss:$16 sps:$4 sm:$0xff]  }
  0x97   :  { %1716 = vmatmul.mubr.bf16.gmra.mrb[24].mxu0 %v5732_v63  ;;  %2168 = vmatmul.mubr.bf16.gmra.mrb[24].mxu1 %v5732_v63  ;;  %v5834_v63 = vld [vmem:[#allocation2 + $0x52c] ss:$16 sps:$4 sm:$0xff]  }
  0x98   :  { %1761 = vmatpush1.bf16.msra.mxu0 %v5733_v0  ;;  %2213 = vmatpush1.bf16.msra.mxu1 %v5736_v1  ;;  %v5829_v0 = vld [vmem:[#allocation2 + $0x520] ss:$16 sps:$4 sm:$0xff]  }
  0x99   :  { %1762 = vmatprep.subr.bf16.mxu0 %v5741_v2  ;;  %2214 = vmatprep.subr.bf16.mxu1 %v5744_v3  ;;  %v5835_v1 = vld [vmem:[%s6851_s0 + $0x124] ss:$28 sps:$4 sm:$0xff]   ;;  %v5832_v2 = vld [vmem:[#allocation2 + $0x528] ss:$16 sps:$4 sm:$0xff]  }
  0x9a   :  { %1725 = vmatprep.mubr.bf16.mxu0 %v5745_v4  ;;  %2177 = vmatprep.mubr.bf16.mxu1 %v5745_v4  ;;  %v5840_v3 = vld [vmem:[#allocation2 + $0x544] ss:$16 sps:$4 sm:$0xff]   ;;  %v5837_v4 = vld [vmem:[%s6851_s0 + $0x120] ss:$28 sps:$4 sm:$0xff]  }
  0x9c   :  { %1763 = vmatpush1.bf16.msra.mxu0 %v5739_v5  ;;  %2215 = vmatpush1.bf16.msra.mxu1 %v5742_v6  ;;  %v5843_v5 = vld [vmem:[#allocation2 + $0x54c] ss:$16 sps:$4 sm:$0xff]   ;;  %v5838_v6 = vld [vmem:[#allocation2 + $0x540] ss:$16 sps:$4 sm:$0xff]  }
  0x9d   :  { %1764 = vmatprep.subr.bf16.mxu0 %v5750_v7  ;;  %2216 = vmatprep.subr.bf16.mxu1 %v5753_v8  ;;  %v5841_v7 = vld [vmem:[#allocation2 + $0x548] ss:$16 sps:$4 sm:$0xff]   ;;  %v5846_v8 = vld [vmem:[#allocation2 + $0x564] ss:$16 sps:$4 sm:$0xff]  }
  0x9f   :  { %1726 = vmatmul.mubr.bf16.gmra.mrb[28].mxu0 %v5747_v9  ;;  %2178 = vmatmul.mubr.bf16.gmra.mrb[28].mxu1 %v5747_v9  ;;  %v5849_v9 = vld [vmem:[#allocation2 + $0x56c] ss:$16 sps:$4 sm:$0xff]  }
  0xa0   :  { %1765 = vmatpush1.bf16.msra.mxu0 %v5748_v10  ;;  %2217 = vmatpush1.bf16.msra.mxu1 %v5751_v11  ;;  %v5850_v10 = vld [vmem:[%s6851_s0 + $0x15c] ss:$28 sps:$4 sm:$0xff]   ;;  %v5844_v11 = vld [vmem:[#allocation2 + $0x560] ss:$16 sps:$4 sm:$0xff]  }
  0xa1   :  { %1766 = vmatprep.subr.bf16.mxu0 %v5756_v12  ;;  %2218 = vmatprep.subr.bf16.mxu1 %v5759_v13  ;;  %v5847_v12 = vld [vmem:[#allocation2 + $0x568] ss:$16 sps:$4 sm:$0xff]   ;;  %v5855_v13 = vld [vmem:[#allocation2 + $0x584] ss:$16 sps:$4 sm:$0xff]  }
  0xa2   :  { %1768 = vmatprep.mubr.bf16.mxu0 %v5762_v14  ;;  %2220 = vmatprep.mubr.bf16.mxu1 %v5762_v14  ;;  %v5858_v14 = vld [vmem:[#allocation2 + $0x58c] ss:$16 sps:$4 sm:$0xff]  }
  0xa4   :  { %1767 = vmatpush1.bf16.msra.mxu0 %v5754_v15  ;;  %2219 = vmatpush1.bf16.msra.mxu1 %v5757_v16  ;;  %v5852_v15 = vld [vmem:[%s6851_s0 + $0x158] ss:$28 sps:$4 sm:$0xff]   ;;  %v5853_v16 = vld [vmem:[#allocation2 + $0x580] ss:$16 sps:$4 sm:$0xff]  }
  0xa5   :  { %1849 = vmatprep.subr.bf16.mxu0 %v5765_v17  ;;  %2301 = vmatprep.subr.bf16.mxu1 %v5768_v18  ;;  %v5856_v17 = vld [vmem:[#allocation2 + $0x588] ss:$16 sps:$4 sm:$0xff]   ;;  %v5861_v18 = vld [vmem:[#allocation2 + $0x5a4] ss:$16 sps:$4 sm:$0xff]  }
  0xa7   :  { %1769 = vmatmul.mubr.bf16.vlgmr.msra.gmra.mrb[0].mxu0 %v5760_v19  ;;  %2221 = vmatmul.mubr.bf16.vlgmr.msra.gmra.mrb[0].mxu1 %v5760_v19  ;;  %v5864_v19 = vld [vmem:[#allocation2 + $0x5ac] ss:$16 sps:$4 sm:$0xff]  }
  0xa8   :  { %1850 = vmatpush1.bf16.msra.mxu0 %v5763_v20  ;;  %2302 = vmatpush1.bf16.msra.mxu1 %v5766_v21  ;;  %v5865_v20 = vld [vmem:[%s6851_s0 + $0x194] ss:$28 sps:$4 sm:$0xff]  }
  0xa9   :  { %1851 = vmatprep.subr.bf16.mxu0 %v5771_v22  ;;  %2303 = vmatprep.subr.bf16.mxu1 %v5774_v23  ;;  %v5859_v21 = vld [vmem:[#allocation2 + $0x5a0] ss:$16 sps:$4 sm:$0xff]   ;;  %v5862_v22 = vld [vmem:[#allocation2 + $0x5a8] ss:$16 sps:$4 sm:$0xff]   ;;  %v5870_v23 = vld [vmem:[#allocation2 + $0x5c4] ss:$16 sps:$4 sm:$0xff]  }
  0xaa   :  { %1778 = vmatprep.mubr.bf16.mxu0 %v5775_v24  ;;  %2230 = vmatprep.mubr.bf16.mxu1 %v5775_v24  ;;  %v5873_v24 = vld [vmem:[#allocation2 + $0x5cc] ss:$16 sps:$4 sm:$0xff]  }
  0xac   :  { %1852 = vmatpush1.bf16.msra.mxu0 %v5769_v25  ;;  %2304 = vmatpush1.bf16.msra.mxu1 %v5772_v26  ;;  %v5867_v25 = vld [vmem:[%s6851_s0 + $0x190] ss:$28 sps:$4 sm:$0xff]  }
  0xad   :  { %1853 = vmatprep.subr.bf16.mxu0 %v5780_v27  ;;  %2305 = vmatprep.subr.bf16.mxu1 %v5783_v28  ;;  %v5868_v26 = vld [vmem:[#allocation2 + $0x5c0] ss:$16 sps:$4 sm:$0xff]   ;;  %v5871_v27 = vld [vmem:[#allocation2 + $0x5c8] ss:$16 sps:$4 sm:$0xff]   ;;  %v5876_v28 = vld [vmem:[#allocation2 + $0x5e4] ss:$16 sps:$4 sm:$0xff]  }
  0xaf   :  { %1779 = vmatmul.mubr.bf16.gmra.mrb[4].mxu0 %v5777_v29  ;;  %2231 = vmatmul.mubr.bf16.gmra.mrb[4].mxu1 %v5777_v29  ;;  %v5879_v29 = vld [vmem:[#allocation2 + $0x5ec] ss:$16 sps:$4 sm:$0xff]  }
  0xb0   :  { %1854 = vmatpush1.bf16.msra.mxu0 %v5778_v30  ;;  %2306 = vmatpush1.bf16.msra.mxu1 %v5781_v31  ;;  %v5882_v30 = vld [vmem:[%s6851_s0 + $0x14] ss:$28 sps:$4 sm:$0xff]  }
  0xb1   :  { %1855 = vmatprep.subr.bf16.mxu0 %v5786_v32  ;;  %2307 = vmatprep.subr.bf16.mxu1 %v5789_v33  ;;  %v5874_v31 = vld [vmem:[#allocation2 + $0x5e0] ss:$16 sps:$4 sm:$0xff]   ;;  %v5877_v32 = vld [vmem:[#allocation2 + $0x5e8] ss:$16 sps:$4 sm:$0xff]   ;;  %v5885_v33 = vld [vmem:[#allocation2 + $0x604] ss:$16 sps:$4 sm:$0xff]  }
  0xb2   :  { %1788 = vmatprep.mubr.bf16.mxu0 %v5790_v34  ;;  %2240 = vmatprep.mubr.bf16.mxu1 %v5790_v34  ;;  %v5909_v34 = vld [vmem:[#allocation2 + $0x60c] ss:$16 sps:$4 sm:$0xff]  }
  0xb4   :  { %1856 = vmatpush1.bf16.msra.mxu0 %v5784_v35  ;;  %2308 = vmatpush1.bf16.msra.mxu1 %v5787_v36  ;;  %v5880_v35 = vld [vmem:[%s6851_s0 + $0x10] ss:$28 sps:$4 sm:$0xff]  }
  0xb5   :  { %1857 = vmatprep.subr.bf16.mxu0 %v5795_v37  ;;  %2309 = vmatprep.subr.bf16.mxu1 %v5798_v38  ;;  %v5883_v36 = vld [vmem:[#allocation2 + $0x600] ss:$16 sps:$4 sm:$0xff]   ;;  %v5886_v37 = vld [vmem:[%s6851_s0 + $0x4c] ss:$28 sps:$4 sm:$0xff]  }
  0xb6   :  { %v5907_v38 = vld [vmem:[#allocation2 + $0x608] ss:$16 sps:$4 sm:$0xff]  }
  0xb7   :  { %1789 = vmatmul.mubr.bf16.gmra.mrb[8].mxu0 %v5792_v39  ;;  %2241 = vmatmul.mubr.bf16.gmra.mrb[8].mxu1 %v5792_v39  ;;  %v5920_v39 = vld [vmem:[#allocation5 + $0x4] ss:$16 sps:$4 sm:$0xff]  }
  0xb8   :  { %1858 = vmatpush1.bf16.msra.mxu0 %v5793_v40  ;;  %2310 = vmatpush1.bf16.msra.mxu1 %v5796_v41  ;;  %v5923_v40 = vld [vmem:[#allocation5 + $0xc] ss:$16 sps:$4 sm:$0xff]   ;;  %v5888_v41 = vld [vmem:[%s6851_s0 + $0x48] ss:$28 sps:$4 sm:$0xff]  }
  0xb9   :  { %1859 = vmatprep.subr.bf16.mxu0 %v5801_v42  ;;  %2311 = vmatprep.subr.bf16.mxu1 %v5804_v43  ;;  %v5889_v42 = vld [vmem:[%s6851_s0 + $0x84] ss:$28 sps:$4 sm:$0xff]  }
  0xba   :  { %1798 = vmatprep.mubr.bf16.mxu0 %v5805_v44  ;;  %2250 = vmatprep.mubr.bf16.mxu1 %v5805_v44  ;;  %v5891_v43 = vld [vmem:[%s6851_s0 + $0x80] ss:$28 sps:$4 sm:$0xff]  }
  0xbb   :  { %v5892_v44 = vld [vmem:[%s6851_s0 + $0xbc] ss:$28 sps:$4 sm:$0xff]  }
  0xbc   :  { %1860 = vmatpush1.bf16.msra.mxu0 %v5799_v45  ;;  %2312 = vmatpush1.bf16.msra.mxu1 %v5802_v46  ;;  %v5894_v45 = vld [vmem:[%s6851_s0 + $0xb8] ss:$28 sps:$4 sm:$0xff]  }
  0xbd   :  { %1861 = vmatprep.subr.bf16.mxu0 %v5810_v47  ;;  %2313 = vmatprep.subr.bf16.mxu1 %v5813_v48  ;;  %v5895_v46 = vld [vmem:[%s6851_s0 + $0xf4] ss:$28 sps:$4 sm:$0xff]   ;;  %v5898_v48 = vld [vmem:[%s6851_s0 + $0x12c] ss:$28 sps:$4 sm:$0xff]  }
  0xbe   :  { %v5897_v47 = vld [vmem:[%s6851_s0 + $0xf0] ss:$28 sps:$4 sm:$0xff]  }
  0xbf   :  { %1799 = vmatmul.mubr.bf16.gmra.mrb[12].mxu0 %v5807_v49  ;;  %2251 = vmatmul.mubr.bf16.gmra.mrb[12].mxu1 %v5807_v49  ;;  %v5900_v49 = vld [vmem:[%s6851_s0 + $0x128] ss:$28 sps:$4 sm:$0xff]  }
  0xc0   :  { %1862 = vmatpush1.bf16.msra.mxu0 %v5808_v50  ;;  %2314 = vmatpush1.bf16.msra.mxu1 %v5811_v51  ;;  %v5901_v50 = vld [vmem:[%s6851_s0 + $0x164] ss:$28 sps:$4 sm:$0xff]  }
  0xc1   :  { %1863 = vmatprep.subr.bf16.mxu0 %v5816_v52  ;;  %2315 = vmatprep.subr.bf16.mxu1 %v5819_v53  ;;  %v5903_v51 = vld [vmem:[%s6851_s0 + $0x160] ss:$28 sps:$4 sm:$0xff]   ;;  %v5906_v53 = vld [vmem:[%s6851_s0 + $0x198] ss:$28 sps:$4 sm:$0xff]  }
  0xc2   :  { %1808 = vmatprep.mubr.bf16.mxu0 %v5820_v54  ;;  %2260 = vmatprep.mubr.bf16.mxu1 %v5820_v54  ;;  %v5904_v52 = vld [vmem:[%s6851_s0 + $0x19c] ss:$28 sps:$4 sm:$0xff]   ;;  %v6218_v54 = vmov 0  }
  0xc4   :  { %1864 = vmatpush1.bf16.msra.mxu0 %v5814_v55  ;;  %2316 = vmatpush1.bf16.msra.mxu1 %v5817_v56  ;;  %v5910_v55 = vld [vmem:[%s6851_s0 + $0x18] ss:$28 sps:$4 sm:$0xff]   ;;  %v5918_v56 = vld [vmem:[#allocation5] ss:$16 sps:$4 sm:$0xff]  }
  0xc5   :  { %1865 = vmatprep.subr.bf16.mxu0 %v5825_v57  ;;  %2317 = vmatprep.subr.bf16.mxu1 %v5828_v58  ;;  %v5921_v57 = vld [vmem:[#allocation5 + $0x8] ss:$16 sps:$4 sm:$0xff]   ;;  %v5926_v58 = vld [vmem:[#allocation5 + $0x24] ss:$16 sps:$4 sm:$0xff]  }
  0xc7   :  { %1809 = vmatmul.mubr.bf16.gmra.mrb[16].mxu0 %v5822_v59  ;;  %2261 = vmatmul.mubr.bf16.gmra.mrb[16].mxu1 %v5822_v59  ;;  %v5929_v59 = vld [vmem:[#allocation5 + $0x2c] ss:$16 sps:$4 sm:$0xff]  }
  0xc8   :  { %1866 = vmatpush1.bf16.msra.mxu0 %v5823_v60  ;;  %2318 = vmatpush1.bf16.msra.mxu1 %v5826_v61  ;;  %v5924_v60 = vld [vmem:[#allocation5 + $0x20] ss:$16 sps:$4 sm:$0xff]   ;;  %v5927_v61 = vld [vmem:[#allocation5 + $0x28] ss:$16 sps:$4 sm:$0xff]  }
  0xc9   :  { %1867 = vmatprep.subr.bf16.mxu0 %v5831_v62  ;;  %2319 = vmatprep.subr.bf16.mxu1 %v5834_v63  ;;  %v5932_v62 = vld [vmem:[#allocation5 + $0x44] ss:$16 sps:$4 sm:$0xff]   ;;  %v5935_v63 = vld [vmem:[#allocation5 + $0x4c] ss:$16 sps:$4 sm:$0xff]  }
  0xca   :  { %1818 = vmatprep.mubr.bf16.mxu0 %v5835_v1  ;;  %2270 = vmatprep.mubr.bf16.mxu1 %v5835_v1  ;;  %v5930_v1 = vld [vmem:[#allocation5 + $0x40] ss:$16 sps:$4 sm:$0xff]  }
  0xcc   :  { %1868 = vmatpush1.bf16.msra.mxu0 %v5829_v0  ;;  %2320 = vmatpush1.bf16.msra.mxu1 %v5832_v2  ;;  %v5911_v0 = vld [vmem:[%s6851_s0 + $0x50] ss:$28 sps:$4 sm:$0xff]   ;;  %v5933_v2 = vld [vmem:[#allocation5 + $0x48] ss:$16 sps:$4 sm:$0xff]  }
  0xcd   :  { %1869 = vmatprep.subr.bf16.mxu0 %v5840_v3  ;;  %2321 = vmatprep.subr.bf16.mxu1 %v5843_v5  ;;  %v5938_v3 = vld [vmem:[#allocation5 + $0x64] ss:$16 sps:$4 sm:$0xff]   ;;  %v5936_v5 = vld [vmem:[#allocation5 + $0x60] ss:$16 sps:$4 sm:$0xff]  }
  0xcf   :  { %1819 = vmatmul.mubr.bf16.gmra.mrb[20].mxu0 %v5837_v4  ;;  %2271 = vmatmul.mubr.bf16.gmra.mrb[20].mxu1 %v5837_v4  ;;  %v5941_v4 = vld [vmem:[#allocation5 + $0x6c] ss:$16 sps:$4 sm:$0xff]  }
  0xd0   :  { %1870 = vmatpush1.bf16.msra.mxu0 %v5838_v6  ;;  %2322 = vmatpush1.bf16.msra.mxu1 %v5841_v7  ;;  %v5939_v6 = vld [vmem:[#allocation5 + $0x68] ss:$16 sps:$4 sm:$0xff]   ;;  %v5944_v7 = vld [vmem:[#allocation5 + $0x84] ss:$16 sps:$4 sm:$0xff]  }
  0xd1   :  { %1871 = vmatprep.subr.bf16.mxu0 %v5846_v8  ;;  %2323 = vmatprep.subr.bf16.mxu1 %v5849_v9  ;;  %v5947_v8 = vld [vmem:[#allocation5 + $0x8c] ss:$16 sps:$4 sm:$0xff]   ;;  %v5912_v9 = vld [vmem:[%s6851_s0 + $0x88] ss:$28 sps:$4 sm:$0xff]  }
  0xd2   :  { %1828 = vmatprep.mubr.bf16.mxu0 %v5850_v10  ;;  %2280 = vmatprep.mubr.bf16.mxu1 %v5850_v10  ;;  %v5942_v10 = vld [vmem:[#allocation5 + $0x80] ss:$16 sps:$4 sm:$0xff]  }
  0xd4   :  { %1872 = vmatpush1.bf16.msra.mxu0 %v5844_v11  ;;  %2324 = vmatpush1.bf16.msra.mxu1 %v5847_v12  ;;  %v5945_v11 = vld [vmem:[#allocation5 + $0x88] ss:$16 sps:$4 sm:$0xff]   ;;  %v5950_v12 = vld [vmem:[#allocation5 + $0xa4] ss:$16 sps:$4 sm:$0xff]  }
  0xd5   :  { %1873 = vmatprep.subr.bf16.mxu0 %v5855_v13  ;;  %2325 = vmatprep.subr.bf16.mxu1 %v5858_v14  ;;  %v5953_v13 = vld [vmem:[#allocation5 + $0xac] ss:$16 sps:$4 sm:$0xff]   ;;  %v5948_v14 = vld [vmem:[#allocation5 + $0xa0] ss:$16 sps:$4 sm:$0xff]  }
  0xd7   :  { %1829 = vmatmul.mubr.bf16.gmra.mrb[24].mxu0 %v5852_v15  ;;  %2281 = vmatmul.mubr.bf16.gmra.mrb[24].mxu1 %v5852_v15  ;;  %v5951_v15 = vld [vmem:[#allocation5 + $0xa8] ss:$16 sps:$4 sm:$0xff]  }
  0xd8   :  { %1874 = vmatpush1.bf16.msra.mxu0 %v5853_v16  ;;  %2326 = vmatpush1.bf16.msra.mxu1 %v5856_v17  ;;  %v5956_v16 = vld [vmem:[#allocation5 + $0xc4] ss:$16 sps:$4 sm:$0xff]   ;;  %v5959_v17 = vld [vmem:[#allocation5 + $0xcc] ss:$16 sps:$4 sm:$0xff]  }
  0xd9   :  { %1875 = vmatprep.subr.bf16.mxu0 %v5861_v18  ;;  %2327 = vmatprep.subr.bf16.mxu1 %v5864_v19  ;;  %v5913_v18 = vld [vmem:[%s6851_s0 + $0xc0] ss:$28 sps:$4 sm:$0xff]  }
  0xda   :  { %1838 = vmatprep.mubr.bf16.mxu0 %v5865_v20  ;;  %2290 = vmatprep.mubr.bf16.mxu1 %v5865_v20  ;;  %v5954_v19 = vld [vmem:[#allocation5 + $0xc0] ss:$16 sps:$4 sm:$0xff]   ;;  %v5957_v20 = vld [vmem:[#allocation5 + $0xc8] ss:$16 sps:$4 sm:$0xff]  }
  0xdc   :  { %1876 = vmatpush1.bf16.msra.mxu0 %v5859_v21  ;;  %2328 = vmatpush1.bf16.msra.mxu1 %v5862_v22  ;;  %v5962_v21 = vld [vmem:[#allocation5 + $0xe4] ss:$16 sps:$4 sm:$0xff]   ;;  %v5965_v22 = vld [vmem:[#allocation5 + $0xec] ss:$16 sps:$4 sm:$0xff]  }
  0xdd   :  { %1877 = vmatprep.subr.bf16.mxu0 %v5870_v23  ;;  %2329 = vmatprep.subr.bf16.mxu1 %v5873_v24  ;;  %v5960_v23 = vld [vmem:[#allocation5 + $0xe0] ss:$16 sps:$4 sm:$0xff]   ;;  %v5963_v24 = vld [vmem:[#allocation5 + $0xe8] ss:$16 sps:$4 sm:$0xff]  }
  0xdf   :  { %1839 = vmatmul.mubr.bf16.gmra.mrb[28].mxu0 %v5867_v25  ;;  %2291 = vmatmul.mubr.bf16.gmra.mrb[28].mxu1 %v5867_v25  ;;  %v5968_v25 = vld [vmem:[#allocation5 + $0x104] ss:$16 sps:$4 sm:$0xff]  }
  0xe0   :  { %1878 = vmatpush1.bf16.msra.mxu0 %v5868_v26  ;;  %2330 = vmatpush1.bf16.msra.mxu1 %v5871_v27  ;;  %v5971_v26 = vld [vmem:[#allocation5 + $0x10c] ss:$16 sps:$4 sm:$0xff]   ;;  %v5914_v27 = vld [vmem:[%s6851_s0 + $0xf8] ss:$28 sps:$4 sm:$0xff]  }
  0xe1   :  { %1879 = vmatprep.subr.bf16.mxu0 %v5876_v28  ;;  %2331 = vmatprep.subr.bf16.mxu1 %v5879_v29  ;;  %v5966_v28 = vld [vmem:[#allocation5 + $0x100] ss:$16 sps:$4 sm:$0xff]   ;;  %v5969_v29 = vld [vmem:[#allocation5 + $0x108] ss:$16 sps:$4 sm:$0xff]  }
  0xe2   :  { %1881 = vmatprep.mubr.bf16.mxu0 %v5882_v30  ;;  %2333 = vmatprep.mubr.bf16.mxu1 %v5882_v30  ;;  %v5974_v30 = vld [vmem:[#allocation5 + $0x124] ss:$16 sps:$4 sm:$0xff]  }
  0xe4   :  { %1880 = vmatpush1.bf16.msra.mxu0 %v5874_v31  ;;  %2332 = vmatpush1.bf16.msra.mxu1 %v5877_v32  ;;  %v5977_v31 = vld [vmem:[#allocation5 + $0x12c] ss:$16 sps:$4 sm:$0xff]   ;;  %v5972_v32 = vld [vmem:[#allocation5 + $0x120] ss:$16 sps:$4 sm:$0xff]  }
  0xe5   :  { %1962 = vmatprep.subr.bf16.mxu0 %v5885_v33  ;;  %2414 = vmatprep.subr.bf16.mxu1 %v5909_v34  ;;  %v5975_v33 = vld [vmem:[#allocation5 + $0x128] ss:$16 sps:$4 sm:$0xff]   ;;  %v5980_v34 = vld [vmem:[#allocation5 + $0x144] ss:$16 sps:$4 sm:$0xff]  }
  0xe7   :  { %1882 = vmatmul.mubr.bf16.vlgmr.msra.gmra.mrb[0].mxu0 %v5880_v35  ;;  %2334 = vmatmul.mubr.bf16.vlgmr.msra.gmra.mrb[0].mxu1 %v5880_v35  ;;  %v5983_v35 = vld [vmem:[#allocation5 + $0x14c] ss:$16 sps:$4 sm:$0xff]  }
  0xe8   :  { %1963 = vmatpush1.bf16.msra.mxu0 %v5883_v36  ;;  %1891 = vmatprep.mubr.bf16.mxu0 %v5886_v37  ;;  %v5915_v36 = vld [vmem:[%s6851_s0 + $0x130] ss:$28 sps:$4 sm:$0xff]  }
  0xe9   :  { %2343 = vmatprep.mubr.bf16.mxu1 %v5886_v37  ;;  %2415 = vmatpush1.bf16.msra.mxu1 %v5907_v38  ;;  %v5978_v37 = vld [vmem:[#allocation5 + $0x140] ss:$16 sps:$4 sm:$0xff]   ;;  %v5981_v38 = vld [vmem:[#allocation5 + $0x148] ss:$16 sps:$4 sm:$0xff]  }
  0xea   :  { %3413 = vmatprep.subr.bf16.mxu0 %v5920_v39  ;;  %3639 = vmatprep.subr.bf16.mxu1 %v5923_v40  ;;  %v5986_v39 = vld [vmem:[#allocation5 + $0x164] ss:$16 sps:$4 sm:$0xff]   ;;  %v5989_v40 = vld [vmem:[#allocation5 + $0x16c] ss:$16 sps:$4 sm:$0xff]  }
  0xef   :  { %1892 = vmatmul.mubr.bf16.gmra.mrb[4].mxu0 %v5888_v41  ;;  %2344 = vmatmul.mubr.bf16.gmra.mrb[4].mxu1 %v5888_v41  ;;  %v5984_v41 = vld [vmem:[#allocation5 + $0x160] ss:$16 sps:$4 sm:$0xff]  }
  0xf0   :  { %1901 = vmatprep.mubr.bf16.mxu0 %v5889_v42  ;;  %2353 = vmatprep.mubr.bf16.mxu1 %v5889_v42  ;;  %v5987_v42 = vld [vmem:[#allocation5 + $0x168] ss:$16 sps:$4 sm:$0xff]  }
  0xf7   :  { %1902 = vmatmul.mubr.bf16.gmra.mrb[8].mxu0 %v5891_v43  ;;  %2354 = vmatmul.mubr.bf16.gmra.mrb[8].mxu1 %v5891_v43  ;;  %v5992_v43 = vld [vmem:[#allocation5 + $0x184] ss:$16 sps:$4 sm:$0xff]  }
  0xf8   :  { %1911 = vmatprep.mubr.bf16.mxu0 %v5892_v44  ;;  %2363 = vmatprep.mubr.bf16.mxu1 %v5892_v44  ;;  %v5995_v44 = vld [vmem:[#allocation5 + $0x18c] ss:$16 sps:$4 sm:$0xff]  }
  0xff   :  { %1912 = vmatmul.mubr.bf16.gmra.mrb[12].mxu0 %v5894_v45  ;;  %2364 = vmatmul.mubr.bf16.gmra.mrb[12].mxu1 %v5894_v45  ;;  %v5916_v45 = vld [vmem:[%s6851_s0 + $0x168] ss:$28 sps:$4 sm:$0xff]  }
 0x100   :  { %1921 = vmatprep.mubr.bf16.mxu0 %v5895_v46  ;;  %2373 = vmatprep.mubr.bf16.mxu1 %v5895_v46  ;;  %v5990_v46 = vld [vmem:[#allocation5 + $0x180] ss:$16 sps:$4 sm:$0xff]  }
 0x107   :  { %1922 = vmatmul.mubr.bf16.gmra.mrb[16].mxu0 %v5897_v47  ;;  %2374 = vmatmul.mubr.bf16.gmra.mrb[16].mxu1 %v5897_v47  ;;  %v5993_v47 = vld [vmem:[#allocation5 + $0x188] ss:$16 sps:$4 sm:$0xff]  }
 0x108   :  { %1931 = vmatprep.mubr.bf16.mxu0 %v5898_v48  ;;  %2383 = vmatprep.mubr.bf16.mxu1 %v5898_v48  ;;  %v5998_v48 = vld [vmem:[#allocation5 + $0x1a4] ss:$16 sps:$4 sm:$0xff]  }
 0x10f   :  { %1932 = vmatmul.mubr.bf16.gmra.mrb[20].mxu0 %v5900_v49  ;;  %2384 = vmatmul.mubr.bf16.gmra.mrb[20].mxu1 %v5900_v49  ;;  %v6001_v49 = vld [vmem:[#allocation5 + $0x1ac] ss:$16 sps:$4 sm:$0xff]  }
 0x110   :  { %1941 = vmatprep.mubr.bf16.mxu0 %v5901_v50  ;;  %2393 = vmatprep.mubr.bf16.mxu1 %v5901_v50  ;;  %v5996_v50 = vld [vmem:[#allocation5 + $0x1a0] ss:$16 sps:$4 sm:$0xff]  }
 0x117   :  { %1942 = vmatmul.mubr.bf16.gmra.mrb[24].mxu0 %v5903_v51  ;;  %2394 = vmatmul.mubr.bf16.gmra.mrb[24].mxu1 %v5903_v51  ;;  %v5999_v51 = vld [vmem:[#allocation5 + $0x1a8] ss:$16 sps:$4 sm:$0xff]  }
 0x118   :  { %1951 = vmatprep.mubr.bf16.mxu0 %v5904_v52  ;;  %2403 = vmatprep.mubr.bf16.mxu1 %v5904_v52  ;;  %v5917_v52 = vld [vmem:[%s6851_s0 + $0x1a0] ss:$28 sps:$4 sm:$0xff]  }
 0x11f   :  { %1952 = vmatmul.mubr.bf16.gmra.mrb[28].mxu0 %v5906_v53  ;;  %2404 = vmatmul.mubr.bf16.gmra.mrb[28].mxu1 %v5906_v53  ;;  %v6004_v53 = vld [vmem:[#allocation5 + $0x1c4] ss:$16 sps:$4 sm:$0xff]  }
 0x120   :  { %1994 = vmatprep.mubr.bf16.mxu0 %v6218_v54  ;;  %2446 = vmatprep.mubr.bf16.mxu1 %v6218_v54 }
 0x127   :  { %4768 = vmatmul.mubr.msk.bf16.vlgmr.msra.gmra.mrb[0].mxu0 %vm1598_vm0, %v5910_v55  ;;  %4776 = vmatmul.mubr.msk.bf16.vlgmr.msra.gmra.mrb[0].mxu1 %vm1598_vm0, %v5910_v55  ;;  %v6007_v55 = vld [vmem:[#allocation5 + $0x1cc] ss:$16 sps:$4 sm:$0xff]  }
 0x128   :  { %2004 = vmatprep.mubr.bf16.mxu0 %v6218_v54  ;;  %2456 = vmatprep.mubr.bf16.mxu1 %v6218_v54 }
 0x129   :  { %3414 = vmatpush1.bf16.msra.mxu0 %v5918_v56  ;;  %3640 = vmatpush1.bf16.msra.mxu1 %v5921_v57  ;;  %v6002_v56 = vld [vmem:[#allocation5 + $0x1c0] ss:$16 sps:$4 sm:$0xff]   ;;  %v6010_v57 = vld [vmem:[#allocation5 + $0x1e4] ss:$16 sps:$4 sm:$0xff]  }
 0x12a   :  { %3415 = vmatprep.subr.bf16.mxu0 %v5926_v58  ;;  %3641 = vmatprep.subr.bf16.mxu1 %v5929_v59  ;;  %v6013_v58 = vld [vmem:[#allocation5 + $0x1ec] ss:$16 sps:$4 sm:$0xff]   ;;  %v6008_v59 = vld [vmem:[#allocation5 + $0x1e0] ss:$16 sps:$4 sm:$0xff]  }
 0x12d   :  { %3416 = vmatpush1.bf16.msra.mxu0 %v5924_v60  ;;  %3642 = vmatpush1.bf16.msra.mxu1 %v5927_v61  ;;  %v6011_v60 = vld [vmem:[#allocation5 + $0x1e8] ss:$16 sps:$4 sm:$0xff]   ;;  %v6016_v61 = vld [vmem:[#allocation5 + $0x204] ss:$16 sps:$4 sm:$0xff]  }
 0x12e   :  { %3417 = vmatprep.subr.bf16.mxu0 %v5932_v62  ;;  %3643 = vmatprep.subr.bf16.mxu1 %v5935_v63  ;;  %v6019_v62 = vld [vmem:[#allocation5 + $0x20c] ss:$16 sps:$4 sm:$0xff]   ;;  %v318_v63 = vlaneseq }
 0x12f   :  { %4769 = vmatmul.mubr.msk.bf16.gmra.mrb[4].mxu0 %vm1598_vm0, %v5911_v0  ;;  %4777 = vmatmul.mubr.msk.bf16.gmra.mrb[4].mxu1 %vm1598_vm0, %v5911_v0 }
 0x130   :  { %2014 = vmatprep.mubr.bf16.mxu0 %v6218_v54  ;;  %2466 = vmatprep.mubr.bf16.mxu1 %v6218_v54  ;;  %v6486_v0 = vshrl.u32 %v318_v63, 7 }
 0x131   :  { %3418 = vmatpush1.bf16.msra.mxu0 %v5930_v1  ;;  %3644 = vmatpush1.bf16.msra.mxu1 %v5933_v2 }
 0x132   :  { %3419 = vmatprep.subr.bf16.mxu0 %v5938_v3  ;;  %3645 = vmatprep.subr.bf16.mxu1 %v5941_v4  ;;  %v320_v1 = vsub.s32 0, %v6486_v0  ;;  %v328_v2 = vsub.s32 2, %v6486_v0  ;;  %v316_v3 = vld [vmem:[%s6853_s2] sm:$0xf]  ;;  %v324_v4 = vsub.s32 1, %v6486_v0 }
 0x135   :  { %3420 = vmatpush1.bf16.msra.mxu0 %v5936_v5  ;;  %3646 = vmatpush1.bf16.msra.mxu1 %v5939_v6  ;;  %v332_v5 = vsub.s32 3, %v6486_v0  ;;  %v6497_v6 = vrot.slane %v316_v3, %v320_v1 }
 0x136   :  { %3421 = vmatprep.subr.bf16.mxu0 %v5944_v7  ;;  %3647 = vmatprep.subr.bf16.mxu1 %v5947_v8  ;;  %v6501_v7 = vrot.slane %v316_v3, %v328_v2  ;;  %v6505_v8 = vrot.slane %v316_v3, %v324_v4 }
 0x137   :  { %4770 = vmatmul.mubr.msk.bf16.gmra.mrb[8].mxu0 %vm1598_vm0, %v5912_v9  ;;  %4778 = vmatmul.mubr.msk.bf16.gmra.mrb[8].mxu1 %vm1598_vm0, %v5912_v9  ;;  %v6509_v9 = vrot.slane %v316_v3, %v332_v5 }
 0x138   :  { %2024 = vmatprep.mubr.bf16.mxu0 %v6218_v54  ;;  %2476 = vmatprep.mubr.bf16.mxu1 %v6218_v54 }
 0x139   :  { %3422 = vmatpush1.bf16.msra.mxu0 %v5942_v10  ;;  %3648 = vmatpush1.bf16.msra.mxu1 %v5945_v11 }
 0x13a   :  { %3423 = vmatprep.subr.bf16.mxu0 %v5950_v12  ;;  %3649 = vmatprep.subr.bf16.mxu1 %v5953_v13 }
 0x13d   :  { %3424 = vmatpush1.bf16.msra.mxu0 %v5948_v14  ;;  %3650 = vmatpush1.bf16.msra.mxu1 %v5951_v15 }
 0x13e   :  { %3425 = vmatprep.subr.bf16.mxu0 %v5956_v16  ;;  %3651 = vmatprep.subr.bf16.mxu1 %v5959_v17 }
 0x13f   :  { %4771 = vmatmul.mubr.msk.bf16.gmra.mrb[12].mxu0 %vm1598_vm0, %v5913_v18  ;;  %4779 = vmatmul.mubr.msk.bf16.gmra.mrb[12].mxu1 %vm1598_vm0, %v5913_v18 }
 0x140   :  { %2034 = vmatprep.mubr.bf16.mxu0 %v6218_v54  ;;  %2486 = vmatprep.mubr.bf16.mxu1 %v6218_v54 }
 0x141   :  { %3426 = vmatpush1.bf16.msra.mxu0 %v5954_v19  ;;  %3652 = vmatpush1.bf16.msra.mxu1 %v5957_v20 }
 0x142   :  { %3427 = vmatprep.subr.bf16.mxu0 %v5962_v21  ;;  %3653 = vmatprep.subr.bf16.mxu1 %v5965_v22 }
 0x145   :  { %3428 = vmatpush1.bf16.msra.mxu0 %v5960_v23  ;;  %3654 = vmatpush1.bf16.msra.mxu1 %v5963_v24 }
 0x146   :  { %3429 = vmatprep.subr.bf16.mxu0 %v5968_v25  ;;  %3655 = vmatprep.subr.bf16.mxu1 %v5971_v26 }
 0x147   :  { %4772 = vmatmul.mubr.msk.bf16.gmra.mrb[16].mxu0 %vm1598_vm0, %v5914_v27  ;;  %4780 = vmatmul.mubr.msk.bf16.gmra.mrb[16].mxu1 %vm1598_vm0, %v5914_v27 }
 0x148   :  { %2044 = vmatprep.mubr.bf16.mxu0 %v6218_v54  ;;  %2496 = vmatprep.mubr.bf16.mxu1 %v6218_v54 }
 0x149   :  { %3430 = vmatpush1.bf16.msra.mxu0 %v5966_v28  ;;  %3656 = vmatpush1.bf16.msra.mxu1 %v5969_v29 }
 0x14a   :  { %3431 = vmatprep.subr.bf16.mxu0 %v5974_v30  ;;  %3657 = vmatprep.subr.bf16.mxu1 %v5977_v31 }
 0x14d   :  { %3432 = vmatpush1.bf16.msra.mxu0 %v5972_v32  ;;  %3658 = vmatpush1.bf16.msra.mxu1 %v5975_v33 }
 0x14e   :  { %3433 = vmatprep.subr.bf16.mxu0 %v5980_v34  ;;  %3659 = vmatprep.subr.bf16.mxu1 %v5983_v35 }
 0x14f   :  { %4773 = vmatmul.mubr.msk.bf16.gmra.mrb[20].mxu0 %vm1598_vm0, %v5915_v36  ;;  %4781 = vmatmul.mubr.msk.bf16.gmra.mrb[20].mxu1 %vm1598_vm0, %v5915_v36 }
 0x150   :  { %2054 = vmatprep.mubr.bf16.mxu0 %v6218_v54  ;;  %2506 = vmatprep.mubr.bf16.mxu1 %v6218_v54 }
 0x151   :  { %3434 = vmatpush1.bf16.msra.mxu0 %v5978_v37  ;;  %3660 = vmatpush1.bf16.msra.mxu1 %v5981_v38 }
 0x152   :  { %3435 = vmatprep.subr.bf16.mxu0 %v5986_v39  ;;  %3661 = vmatprep.subr.bf16.mxu1 %v5989_v40  ;;  %v6014_v40 = vld [vmem:[#allocation5 + $0x200] ss:$16 sps:$4 sm:$0xff]  }
 0x155   :  { %3436 = vmatpush1.bf16.msra.mxu0 %v5984_v41  ;;  %3662 = vmatpush1.bf16.msra.mxu1 %v5987_v42  ;;  %v6017_v41 = vld [vmem:[#allocation5 + $0x208] ss:$16 sps:$4 sm:$0xff]  }
 0x156   :  { %3437 = vmatprep.subr.bf16.mxu0 %v5992_v43  ;;  %3663 = vmatprep.subr.bf16.mxu1 %v5995_v44 }
 0x157   :  { %4774 = vmatmul.mubr.msk.bf16.gmra.mrb[24].mxu0 %vm1598_vm0, %v5916_v45  ;;  %4782 = vmatmul.mubr.msk.bf16.gmra.mrb[24].mxu1 %vm1598_vm0, %v5916_v45 }
 0x158   :  { %2064 = vmatprep.mubr.bf16.mxu0 %v6218_v54  ;;  %2516 = vmatprep.mubr.bf16.mxu1 %v6218_v54  ;;  %v6005_v54 = vld [vmem:[#allocation5 + $0x1c8] ss:$16 sps:$4 sm:$0xff]  }
 0x159   :  { %3438 = vmatpush1.bf16.msra.mxu0 %v5990_v46  ;;  %3664 = vmatpush1.bf16.msra.mxu1 %v5993_v47  ;;  %v6022_v46 = vld [vmem:[#allocation5 + $0x224] ss:$16 sps:$4 sm:$0xff]   ;;  %v6025_v47 = vld [vmem:[#allocation5 + $0x22c] ss:$16 sps:$4 sm:$0xff]  }
 0x15a   :  { %3439 = vmatprep.subr.bf16.mxu0 %v5998_v48  ;;  %3665 = vmatprep.subr.bf16.mxu1 %v6001_v49 }
 0x15d   :  { %3440 = vmatpush1.bf16.msra.mxu0 %v5996_v50  ;;  %3666 = vmatpush1.bf16.msra.mxu1 %v5999_v51 }
 0x15e   :  { %3441 = vmatprep.subr.bf16.mxu0 %v6004_v53  ;;  %3667 = vmatprep.subr.bf16.mxu1 %v6007_v55 }
 0x15f   :  { %4775 = vmatmul.mubr.msk.bf16.gmra.mrb[28].mxu0 %vm1598_vm0, %v5917_v52  ;;  %4783 = vmatmul.mubr.msk.bf16.gmra.mrb[28].mxu1 %vm1598_vm0, %v5917_v52 }
 0x161   :  { %3442 = vmatpush1.bf16.msra.mxu0 %v6002_v56  ;;  %3668 = vmatpush1.bf16.msra.mxu1 %v6005_v54 }
 0x162   :  { %3443 = vmatprep.subr.bf16.mxu0 %v6010_v57  ;;  %3669 = vmatprep.subr.bf16.mxu1 %v6013_v58  ;;  %v6020_v58 = vld [vmem:[#allocation5 + $0x220] ss:$16 sps:$4 sm:$0xff]  }
 0x165   :  { %3444 = vmatpush1.bf16.msra.mxu0 %v6008_v59  ;;  %3670 = vmatpush1.bf16.msra.mxu1 %v6011_v60  ;;  %v6023_v59 = vld [vmem:[#allocation5 + $0x228] ss:$16 sps:$4 sm:$0xff]   ;;  %v6028_v60 = vld [vmem:[#allocation5 + $0x244] ss:$16 sps:$4 sm:$0xff]  }
 0x166   :  { %3526 = vmatprep.subr.bf16.mxu0 %v6016_v61  ;;  %3752 = vmatprep.subr.bf16.mxu1 %v6019_v62 }
 0x1fa   :  { %v1996_v10 = vpop.f32.mrb[0].mxu0  ;;  %v2448_v11 = vpop.f32.mrb[0].mxu1 }
 0x1fb   :  { %v5152_v12 = vadd.f32 %v1996_v10, %v6497_v6  ;;  %v5184_v13 = vadd.f32 %v2448_v11, %v6501_v7  ;;  %v1998_v14 = vpop.f32.mrb[1].mxu0  ;;  %v2450_v15 = vpop.f32.mrb[1].mxu1  ;;  %v6031_v10 = vld [vmem:[#allocation5 + $0x24c] ss:$16 sps:$4 sm:$0xff]  }
 0x1fc   :  { %v5153_v16 = vadd.f32 %v1998_v14, %v6505_v8  ;;  %v5185_v17 = vadd.f32 %v2450_v15, %v6509_v9  ;;  %v2000_v18 = vpop.f32.mrb[2].mxu0  ;;  %v2452_v19 = vpop.f32.mrb[2].mxu1 }
 0x1fd   :  { %v5154_v20 = vadd.f32 %v2000_v18, %v6497_v6  ;;  %v5186_v21 = vadd.f32 %v2452_v19, %v6501_v7  ;;  %v2002_v22 = vpop.f32.mrb[3].mxu0  ;;  %v2454_v23 = vpop.f32.mrb[3].mxu1  ;;  %v2527_v26 = vmax.f32 %v5152_v12, 0.0  ;;  %v2529_v27 = vmax.f32 %v5184_v13, 0.0 }
 0x1fe   :  { %v5155_v24 = vadd.f32 %v2002_v22, %v6505_v8  ;;  %v5187_v25 = vadd.f32 %v2454_v23, %v6509_v9  ;;  %v2528_v30 = vmax.f32 %v5153_v16, 0.0  ;;  %v2530_v31 = vmax.f32 %v5185_v17, 0.0  ;;  %v6029_v22 = vld [vmem:[#allocation5 + $0x248] ss:$16 sps:$4 sm:$0xff]  }
 0x1ff   :  { %v2531_v28 = vmax.f32 %v5154_v20, 0.0  ;;  %v2533_v29 = vmax.f32 %v5186_v21, 0.0  ;;  %v6026_v21 = vld [vmem:[#allocation5 + $0x240] ss:$16 sps:$4 sm:$0xff]  }
 0x200   :  { %v2532_v32 = vmax.f32 %v5155_v24, 0.0  ;;  %v2534_v33 = vmax.f32 %v5187_v25, 0.0 }
 0x201   :  { %v2591_v34 = vpack.c.bf16 %v2531_v28, %v2527_v26  ;;  %v6519_v35 = vpack.c.bf16 %v2533_v29, %v2529_v27  ;;  %v6034_v27 = vld [vmem:[#allocation5 + $0x264] ss:$16 sps:$4 sm:$0xff]   ;;  %v6037_v28 = vld [vmem:[#allocation5 + $0x26c] ss:$16 sps:$4 sm:$0xff]  }
 0x202   :  { %v2592_v36 = vpack.c.bf16 %v2532_v32, %v2528_v30  ;;  %v6521_v37 = vpack.c.bf16 %v2534_v33, %v2530_v31  ;;  %v2006_v38 = vpop.f32.mrb[4].mxu0  ;;  %v2458_v39 = vpop.f32.mrb[4].mxu1 }
 0x203   :  { %v5156_v42 = vadd.f32 %v2006_v38, %v6497_v6  ;;  %v5188_v43 = vadd.f32 %v2458_v39, %v6501_v7  ;;  %v2008_v44 = vpop.f32.mrb[5].mxu0  ;;  %v2460_v45 = vpop.f32.mrb[5].mxu1 }
 0x204   :  { %v5157_v48 = vadd.f32 %v2008_v44, %v6505_v8  ;;  %v5189_v49 = vadd.f32 %v2460_v45, %v6509_v9  ;;  %v2010_v50 = vpop.f32.mrb[6].mxu0  ;;  %v2462_v51 = vpop.f32.mrb[6].mxu1  ;;  %3445 = vmatprep.mubr.bf16.mxu0 %v2592_v36  ;;  %3671 = vmatprep.mubr.bf16.mxu1 %v2592_v36 }
 0x205   :  { %v5158_v52 = vadd.f32 %v2010_v50, %v6497_v6  ;;  %v5190_v53 = vadd.f32 %v2462_v51, %v6501_v7  ;;  %v2012_v55 = vpop.f32.mrb[7].mxu0  ;;  %v2464_v56 = vpop.f32.mrb[7].mxu1  ;;  %3446 = vmatmul.mubr.bf16.vlgmr.msra.gmra.mrb[32].mxu0 %v2591_v34  ;;  %3672 = vmatmul.mubr.bf16.vlgmr.msra.gmra.mrb[32].mxu1 %v2591_v34  ;;  %v2535_v61 = vmax.f32 %v5156_v42, 0.0  ;;  %v2537_v62 = vmax.f32 %v5188_v43, 0.0  ;;  %v6035_v42 = vld [vmem:[#allocation5 + $0x268] ss:$16 sps:$4 sm:$0xff]  }
 0x206   :  { %v5159_v54 = vadd.f32 %v2012_v55, %v6505_v8  ;;  %v5191_v57 = vadd.f32 %v2464_v56, %v6509_v9  ;;  %3527 = vmatpush1.bf16.msra.mxu0 %v6014_v40  ;;  %3753 = vmatpush1.bf16.msra.mxu1 %v6017_v41  ;;  %v2536_v11 = vmax.f32 %v5157_v48, 0.0  ;;  %v2538_v12 = vmax.f32 %v5189_v49, 0.0  ;;  %v6032_v41 = vld [vmem:[#allocation5 + $0x260] ss:$16 sps:$4 sm:$0xff]   ;;  %v6040_v43 = vld [vmem:[#allocation5 + $0x284] ss:$16 sps:$4 sm:$0xff]  }
 0x207   :  { %v2539_v63 = vmax.f32 %v5158_v52, 0.0  ;;  %v2541_v3 = vmax.f32 %v5190_v53, 0.0  ;;  %3528 = vmatprep.subr.bf16.mxu0 %v6022_v46  ;;  %3754 = vmatprep.subr.bf16.mxu1 %v6025_v47  ;;  %v6043_v48 = vld [vmem:[#allocation5 + $0x28c] ss:$16 sps:$4 sm:$0xff]  }
 0x208   :  { %v2540_v13 = vmax.f32 %v5159_v54, 0.0  ;;  %v2542_v14 = vmax.f32 %v5191_v57, 0.0 }
 0x209   :  { %v2595_v15 = vpack.c.bf16 %v2539_v63, %v2535_v61  ;;  %v6531_v16 = vpack.c.bf16 %v2541_v3, %v2537_v62 }
 0x20a   :  { %v2596_v17 = vpack.c.bf16 %v2540_v13, %v2536_v11  ;;  %v6533_v18 = vpack.c.bf16 %v2542_v14, %v2538_v12  ;;  %v2016_v19 = vpop.f32.mrb[8].mxu0  ;;  %v2468_v20 = vpop.f32.mrb[8].mxu1  ;;  %3529 = vmatpush1.bf16.msra.mxu0 %v6020_v58  ;;  %3755 = vmatpush1.bf16.msra.mxu1 %v6023_v59  ;;  %v6038_v59 = vld [vmem:[#allocation5 + $0x280] ss:$16 sps:$4 sm:$0xff]   ;;  %v6049_v11 = vld [vmem:[#allocation5 + $0x2ac] ss:$16 sps:$4 sm:$0xff]  }
 0x20b   :  { %v5160_v23 = vadd.f32 %v2016_v19, %v6497_v6  ;;  %v5192_v24 = vadd.f32 %v2468_v20, %v6501_v7  ;;  %v2018_v25 = vpop.f32.mrb[9].mxu0  ;;  %v2470_v26 = vpop.f32.mrb[9].mxu1  ;;  %3530 = vmatprep.subr.bf16.mxu0 %v6028_v60  ;;  %3756 = vmatprep.subr.bf16.mxu1 %v6031_v10  ;;  %v6041_v60 = vld [vmem:[#allocation5 + $0x288] ss:$16 sps:$4 sm:$0xff]   ;;  %v6046_v10 = vld [vmem:[#allocation5 + $0x2a4] ss:$16 sps:$4 sm:$0xff]  }
 0x20c   :  { %v5161_v29 = vadd.f32 %v2018_v25, %v6505_v8  ;;  %v5193_v30 = vadd.f32 %v2470_v26, %v6509_v9  ;;  %v2020_v31 = vpop.f32.mrb[10].mxu0  ;;  %v2472_v32 = vpop.f32.mrb[10].mxu1  ;;  %3455 = vmatprep.mubr.bf16.mxu0 %v2596_v17  ;;  %3681 = vmatprep.mubr.bf16.mxu1 %v2596_v17  ;;  %v6047_v25 = vld [vmem:[#allocation5 + $0x2a8] ss:$16 sps:$4 sm:$0xff]   ;;  %v6052_v26 = vld [vmem:[#allocation5 + $0x2c4] ss:$16 sps:$4 sm:$0xff]  }
 0x20d   :  { %v5162_v33 = vadd.f32 %v2020_v31, %v6497_v6  ;;  %v5194_v34 = vadd.f32 %v2472_v32, %v6501_v7  ;;  %v2022_v36 = vpop.f32.mrb[11].mxu0  ;;  %v2474_v38 = vpop.f32.mrb[11].mxu1  ;;  %3456 = vmatmul.mubr.bf16.gmra.mrb[36].mxu0 %v2595_v15  ;;  %3682 = vmatmul.mubr.bf16.gmra.mrb[36].mxu1 %v2595_v15  ;;  %v2543_v44 = vmax.f32 %v5160_v23, 0.0  ;;  %v2545_v45 = vmax.f32 %v5192_v24, 0.0  ;;  %v6044_v24 = vld [vmem:[#allocation5 + $0x2a0] ss:$16 sps:$4 sm:$0xff]  }
 0x20e   :  { %v5163_v39 = vadd.f32 %v2022_v36, %v6505_v8  ;;  %v5195_v40 = vadd.f32 %v2474_v38, %v6509_v9  ;;  %3531 = vmatpush1.bf16.msra.mxu0 %v6026_v21  ;;  %3757 = vmatpush1.bf16.msra.mxu1 %v6029_v22  ;;  %v2544_v49 = vmax.f32 %v5161_v29, 0.0  ;;  %v2546_v50 = vmax.f32 %v5193_v30, 0.0  ;;  %v6055_v31 = vld [vmem:[#allocation5 + $0x2cc] ss:$16 sps:$4 sm:$0xff]  }
 0x20f   :  { %v2547_v46 = vmax.f32 %v5162_v33, 0.0  ;;  %v2549_v47 = vmax.f32 %v5194_v34, 0.0  ;;  %3532 = vmatprep.subr.bf16.mxu0 %v6034_v27  ;;  %3758 = vmatprep.subr.bf16.mxu1 %v6037_v28 }
 0x210   :  { %v2548_v51 = vmax.f32 %v5163_v39, 0.0  ;;  %v2550_v52 = vmax.f32 %v5195_v40, 0.0 }
 0x211   :  { %v2599_v53 = vpack.c.bf16 %v2547_v46, %v2543_v44  ;;  %v6543_v55 = vpack.c.bf16 %v2549_v47, %v2545_v45  ;;  %v6050_v44 = vld [vmem:[#allocation5 + $0x2c0] ss:$16 sps:$4 sm:$0xff]   ;;  %v6053_v45 = vld [vmem:[#allocation5 + $0x2c8] ss:$16 sps:$4 sm:$0xff]  }
 0x212   :  { %v2600_v56 = vpack.c.bf16 %v2548_v51, %v2544_v49  ;;  %v6545_v54 = vpack.c.bf16 %v2550_v52, %v2546_v50  ;;  %v2026_v57 = vpop.f32.mrb[12].mxu0  ;;  %v2478_v58 = vpop.f32.mrb[12].mxu1  ;;  %3533 = vmatpush1.bf16.msra.mxu0 %v6032_v41  ;;  %3759 = vmatpush1.bf16.msra.mxu1 %v6035_v42  ;;  %v6058_v50 = vld [vmem:[#allocation5 + $0x2e4] ss:$16 sps:$4 sm:$0xff]   ;;  %v6061_v51 = vld [vmem:[#allocation5 + $0x2ec] ss:$16 sps:$4 sm:$0xff]  }
 0x213   :  { %v5164_v61 = vadd.f32 %v2026_v57, %v6497_v6  ;;  %v5196_v62 = vadd.f32 %v2478_v58, %v6501_v7  ;;  %v2028_v63 = vpop.f32.mrb[13].mxu0  ;;  %v2480_v3 = vpop.f32.mrb[13].mxu1  ;;  %3534 = vmatprep.subr.bf16.mxu0 %v6040_v43  ;;  %3760 = vmatprep.subr.bf16.mxu1 %v6043_v48 }
 0x214   :  { %v5165_v12 = vadd.f32 %v2028_v63, %v6505_v8  ;;  %v5197_v13 = vadd.f32 %v2480_v3, %v6509_v9  ;;  %v2030_v14 = vpop.f32.mrb[14].mxu0  ;;  %v2482_v15 = vpop.f32.mrb[14].mxu1  ;;  %3465 = vmatprep.mubr.bf16.mxu0 %v2600_v56  ;;  %3691 = vmatprep.mubr.bf16.mxu1 %v2600_v56  ;;  %v6056_v3 = vld [vmem:[#allocation5 + $0x2e0] ss:$16 sps:$4 sm:$0xff]  }
 0x215   :  { %v5166_v17 = vadd.f32 %v2030_v14, %v6497_v6  ;;  %v5198_v19 = vadd.f32 %v2482_v15, %v6501_v7  ;;  %v2032_v20 = vpop.f32.mrb[15].mxu0  ;;  %v2484_v21 = vpop.f32.mrb[15].mxu1  ;;  %3466 = vmatmul.mubr.bf16.gmra.mrb[40].mxu0 %v2599_v53  ;;  %3692 = vmatmul.mubr.bf16.gmra.mrb[40].mxu1 %v2599_v53  ;;  %v2551_v27 = vmax.f32 %v5164_v61, 0.0  ;;  %v2553_v28 = vmax.f32 %v5196_v62, 0.0 }
 0x216   :  { %v5167_v22 = vadd.f32 %v2032_v20, %v6505_v8  ;;  %v5199_v23 = vadd.f32 %v2484_v21, %v6509_v9  ;;  %3535 = vmatpush1.bf16.msra.mxu0 %v6038_v59  ;;  %3761 = vmatpush1.bf16.msra.mxu1 %v6041_v60  ;;  %v2552_v32 = vmax.f32 %v5165_v12, 0.0  ;;  %v2554_v33 = vmax.f32 %v5197_v13, 0.0 }
 0x217   :  { %v2555_v29 = vmax.f32 %v5166_v17, 0.0  ;;  %v2557_v30 = vmax.f32 %v5198_v19, 0.0  ;;  %3536 = vmatprep.subr.bf16.mxu0 %v6046_v10  ;;  %3762 = vmatprep.subr.bf16.mxu1 %v6049_v11  ;;  %v6059_v10 = vld [vmem:[#allocation5 + $0x2e8] ss:$16 sps:$4 sm:$0xff]   ;;  %v6064_v11 = vld [vmem:[#allocation5 + $0x304] ss:$16 sps:$4 sm:$0xff]  }
 0x218   :  { %v2556_v34 = vmax.f32 %v5167_v22, 0.0  ;;  %v2558_v36 = vmax.f32 %v5199_v23, 0.0  ;;  %v6067_v17 = vld [vmem:[#allocation5 + $0x30c] ss:$16 sps:$4 sm:$0xff]  }
 0x219   :  { %v2603_v38 = vpack.c.bf16 %v2555_v29, %v2551_v27  ;;  %v6555_v39 = vpack.c.bf16 %v2557_v30, %v2553_v28  ;;  %v6062_v29 = vld [vmem:[#allocation5 + $0x300] ss:$16 sps:$4 sm:$0xff]   ;;  %v6065_v30 = vld [vmem:[#allocation5 + $0x308] ss:$16 sps:$4 sm:$0xff]  }
 0x21a   :  { %v2604_v40 = vpack.c.bf16 %v2556_v34, %v2552_v32  ;;  %v6557_v41 = vpack.c.bf16 %v2558_v36, %v2554_v33  ;;  %v2036_v42 = vpop.f32.mrb[16].mxu0  ;;  %v2488_v43 = vpop.f32.mrb[16].mxu1  ;;  %3537 = vmatpush1.bf16.msra.mxu0 %v6044_v24  ;;  %3763 = vmatpush1.bf16.msra.mxu1 %v6047_v25  ;;  %v6070_v36 = vld [vmem:[#allocation5 + $0x324] ss:$16 sps:$4 sm:$0xff]  }
 0x21b   :  { %v5168_v46 = vadd.f32 %v2036_v42, %v6497_v6  ;;  %v5200_v47 = vadd.f32 %v2488_v43, %v6501_v7  ;;  %v2038_v48 = vpop.f32.mrb[17].mxu0  ;;  %v2490_v49 = vpop.f32.mrb[17].mxu1  ;;  %3538 = vmatprep.subr.bf16.mxu0 %v6052_v26  ;;  %3764 = vmatprep.subr.bf16.mxu1 %v6055_v31 }
 0x21c   :  { %v5169_v52 = vadd.f32 %v2038_v48, %v6505_v8  ;;  %v5201_v53 = vadd.f32 %v2490_v49, %v6509_v9  ;;  %v2040_v56 = vpop.f32.mrb[18].mxu0  ;;  %v2492_v57 = vpop.f32.mrb[18].mxu1  ;;  %3475 = vmatprep.mubr.bf16.mxu0 %v2604_v40  ;;  %3701 = vmatprep.mubr.bf16.mxu1 %v2604_v40 }
 0x21d   :  { %v5170_v58 = vadd.f32 %v2040_v56, %v6497_v6  ;;  %v5202_v59 = vadd.f32 %v2492_v57, %v6501_v7  ;;  %v2042_v60 = vpop.f32.mrb[19].mxu0  ;;  %v2494_v61 = vpop.f32.mrb[19].mxu1  ;;  %3476 = vmatmul.mubr.bf16.gmra.mrb[44].mxu0 %v2603_v38  ;;  %3702 = vmatmul.mubr.bf16.gmra.mrb[44].mxu1 %v2603_v38  ;;  %v2559_v12 = vmax.f32 %v5168_v46, 0.0  ;;  %v2561_v13 = vmax.f32 %v5200_v47, 0.0  ;;  %v6073_v38 = vld [vmem:[#allocation5 + $0x32c] ss:$16 sps:$4 sm:$0xff]  }
 0x21e   :  { %v5171_v62 = vadd.f32 %v2042_v60, %v6505_v8  ;;  %v5203_v63 = vadd.f32 %v2494_v61, %v6509_v9  ;;  %3539 = vmatpush1.bf16.msra.mxu0 %v6050_v44  ;;  %3765 = vmatpush1.bf16.msra.mxu1 %v6053_v45  ;;  %v2560_v19 = vmax.f32 %v5169_v52, 0.0  ;;  %v2562_v20 = vmax.f32 %v5201_v53, 0.0  ;;  %v6071_v52 = vld [vmem:[#allocation5 + $0x328] ss:$16 sps:$4 sm:$0xff]   ;;  %v6076_v53 = vld [vmem:[#allocation5 + $0x344] ss:$16 sps:$4 sm:$0xff]  }
 0x21f   :  { %v2563_v14 = vmax.f32 %v5170_v58, 0.0  ;;  %v2565_v15 = vmax.f32 %v5202_v59, 0.0  ;;  %3540 = vmatprep.subr.bf16.mxu0 %v6058_v50  ;;  %3766 = vmatprep.subr.bf16.mxu1 %v6061_v51  ;;  %v6068_v51 = vld [vmem:[#allocation5 + $0x320] ss:$16 sps:$4 sm:$0xff]   ;;  %v6079_v60 = vld [vmem:[#allocation5 + $0x34c] ss:$16 sps:$4 sm:$0xff]  }
 0x220   :  { %v2564_v21 = vmax.f32 %v5171_v62, 0.0  ;;  %v2566_v22 = vmax.f32 %v5203_v63, 0.0 }
 0x221   :  { %v2607_v23 = vpack.c.bf16 %v2563_v14, %v2559_v12  ;;  %v6567_v24 = vpack.c.bf16 %v2565_v15, %v2561_v13 }
 0x222   :  { %v2608_v25 = vpack.c.bf16 %v2564_v21, %v2560_v19  ;;  %v6569_v26 = vpack.c.bf16 %v2566_v22, %v2562_v20  ;;  %v2046_v27 = vpop.f32.mrb[20].mxu0  ;;  %v2498_v28 = vpop.f32.mrb[20].mxu1  ;;  %3541 = vmatpush1.bf16.msra.mxu0 %v6056_v3  ;;  %3767 = vmatpush1.bf16.msra.mxu1 %v6059_v10  ;;  %v6077_v19 = vld [vmem:[#allocation5 + $0x348] ss:$16 sps:$4 sm:$0xff]  }
 0x223   :  { %v5172_v31 = vadd.f32 %v2046_v27, %v6497_v6  ;;  %v5204_v32 = vadd.f32 %v2498_v28, %v6501_v7  ;;  %v2048_v33 = vpop.f32.mrb[21].mxu0  ;;  %v2500_v34 = vpop.f32.mrb[21].mxu1  ;;  %3542 = vmatprep.subr.bf16.mxu0 %v6064_v11  ;;  %3768 = vmatprep.subr.bf16.mxu1 %v6067_v17  ;;  %v6074_v17 = vld [vmem:[#allocation5 + $0x340] ss:$16 sps:$4 sm:$0xff]   ;;  %v6085_v27 = vld [vmem:[#allocation5 + $0x36c] ss:$16 sps:$4 sm:$0xff]  }
 0x224   :  { %v5173_v40 = vadd.f32 %v2048_v33, %v6505_v8  ;;  %v5205_v42 = vadd.f32 %v2500_v34, %v6509_v9  ;;  %v2050_v43 = vpop.f32.mrb[22].mxu0  ;;  %v2502_v44 = vpop.f32.mrb[22].mxu1  ;;  %3485 = vmatprep.mubr.bf16.mxu0 %v2608_v25  ;;  %3711 = vmatprep.mubr.bf16.mxu1 %v2608_v25  ;;  %v6082_v25 = vld [vmem:[#allocation5 + $0x364] ss:$16 sps:$4 sm:$0xff]  }
 0x225   :  { %v5174_v45 = vadd.f32 %v2050_v43, %v6497_v6  ;;  %v5206_v46 = vadd.f32 %v2502_v44, %v6501_v7  ;;  %v2052_v47 = vpop.f32.mrb[23].mxu0  ;;  %v2504_v48 = vpop.f32.mrb[23].mxu1  ;;  %3486 = vmatmul.mubr.bf16.gmra.mrb[48].mxu0 %v2607_v23  ;;  %3712 = vmatmul.mubr.bf16.gmra.mrb[48].mxu1 %v2607_v23  ;;  %v2567_v56 = vmax.f32 %v5172_v31, 0.0  ;;  %v2569_v57 = vmax.f32 %v5204_v32, 0.0  ;;  %v6083_v43 = vld [vmem:[#allocation5 + $0x368] ss:$16 sps:$4 sm:$0xff]  }
 0x226   :  { %v5175_v49 = vadd.f32 %v2052_v47, %v6505_v8  ;;  %v5207_v50 = vadd.f32 %v2504_v48, %v6509_v9  ;;  %3543 = vmatpush1.bf16.msra.mxu0 %v6062_v29  ;;  %3769 = vmatpush1.bf16.msra.mxu1 %v6065_v30  ;;  %v2568_v61 = vmax.f32 %v5173_v40, 0.0  ;;  %v2570_v62 = vmax.f32 %v5205_v42, 0.0  ;;  %v6080_v42 = vld [vmem:[#allocation5 + $0x360] ss:$16 sps:$4 sm:$0xff]   ;;  %v6088_v44 = vld [vmem:[#allocation5 + $0x384] ss:$16 sps:$4 sm:$0xff]  }
 0x227   :  { %v2571_v58 = vmax.f32 %v5174_v45, 0.0  ;;  %v2573_v59 = vmax.f32 %v5206_v46, 0.0  ;;  %3544 = vmatprep.subr.bf16.mxu0 %v6070_v36  ;;  %3770 = vmatprep.subr.bf16.mxu1 %v6073_v38 }
 0x228   :  { %v2572_v63 = vmax.f32 %v5175_v49, 0.0  ;;  %v2574_v3 = vmax.f32 %v5207_v50, 0.0  ;;  %v6091_v49 = vld [vmem:[#allocation5 + $0x38c] ss:$16 sps:$4 sm:$0xff]  }
 0x229   :  { %v2611_v10 = vpack.c.bf16 %v2571_v58, %v2567_v56  ;;  %v6579_v11 = vpack.c.bf16 %v2573_v59, %v2569_v57 }
 0x22a   :  { %v2612_v12 = vpack.c.bf16 %v2572_v63, %v2568_v61  ;;  %v6581_v13 = vpack.c.bf16 %v2574_v3, %v2570_v62  ;;  %v2056_v14 = vpop.f32.mrb[24].mxu0  ;;  %v2508_v15 = vpop.f32.mrb[24].mxu1  ;;  %3545 = vmatpush1.bf16.msra.mxu0 %v6068_v51  ;;  %3771 = vmatpush1.bf16.msra.mxu1 %v6071_v52  ;;  %v6086_v62 = vld [vmem:[#allocation5 + $0x380] ss:$16 sps:$4 sm:$0xff]   ;;  %v6089_v63 = vld [vmem:[#allocation5 + $0x388] ss:$16 sps:$4 sm:$0xff]  }
 0x22b   :  { %v5176_v20 = vadd.f32 %v2056_v14, %v6497_v6  ;;  %v5208_v21 = vadd.f32 %v2508_v15, %v6501_v7  ;;  %v2058_v22 = vpop.f32.mrb[25].mxu0  ;;  %v2510_v23 = vpop.f32.mrb[25].mxu1  ;;  %3546 = vmatprep.subr.bf16.mxu0 %v6076_v53  ;;  %3772 = vmatprep.subr.bf16.mxu1 %v6079_v60  ;;  %v6094_v15 = vld [vmem:[#allocation5 + $0x3a4] ss:$16 sps:$4 sm:$0xff]  }
 0x22c   :  { %v5177_v28 = vadd.f32 %v2058_v22, %v6505_v8  ;;  %v5209_v29 = vadd.f32 %v2510_v23, %v6509_v9  ;;  %v2060_v30 = vpop.f32.mrb[26].mxu0  ;;  %v2512_v31 = vpop.f32.mrb[26].mxu1  ;;  %3495 = vmatprep.mubr.bf16.mxu0 %v2612_v12  ;;  %3721 = vmatprep.mubr.bf16.mxu1 %v2612_v12 }
 0x22d   :  { %v5178_v32 = vadd.f32 %v2060_v30, %v6497_v6  ;;  %v5210_v33 = vadd.f32 %v2512_v31, %v6501_v7  ;;  %v2062_v34 = vpop.f32.mrb[27].mxu0  ;;  %v2514_v36 = vpop.f32.mrb[27].mxu1  ;;  %3496 = vmatmul.mubr.bf16.gmra.mrb[52].mxu0 %v2611_v10  ;;  %3722 = vmatmul.mubr.bf16.gmra.mrb[52].mxu1 %v2611_v10  ;;  %v2575_v45 = vmax.f32 %v5176_v20, 0.0  ;;  %v2577_v46 = vmax.f32 %v5208_v21, 0.0  ;;  %v6092_v31 = vld [vmem:[#allocation5 + $0x3a0] ss:$16 sps:$4 sm:$0xff]  }
 0x22e   :  { %v5179_v38 = vadd.f32 %v2062_v34, %v6505_v8  ;;  %v5211_v40 = vadd.f32 %v2514_v36, %v6509_v9  ;;  %3547 = vmatpush1.bf16.msra.mxu0 %v6074_v17  ;;  %3773 = vmatpush1.bf16.msra.mxu1 %v6077_v19  ;;  %v2576_v50 = vmax.f32 %v5177_v28, 0.0  ;;  %v2578_v51 = vmax.f32 %v5209_v29, 0.0  ;;  %v6097_v17 = vld [vmem:[#allocation5 + $0x3ac] ss:$16 sps:$4 sm:$0xff]  }
 0x22f   :  { %v2579_v47 = vmax.f32 %v5178_v32, 0.0  ;;  %v2581_v48 = vmax.f32 %v5210_v33, 0.0  ;;  %3548 = vmatprep.subr.bf16.mxu0 %v6082_v25  ;;  %3774 = vmatprep.subr.bf16.mxu1 %v6085_v27  ;;  %v6095_v32 = vld [vmem:[#allocation5 + $0x3a8] ss:$16 sps:$4 sm:$0xff]   ;;  %v6100_v33 = vld [vmem:[#allocation5 + $0x3c4] ss:$16 sps:$4 sm:$0xff]  }
 0x230   :  { %v2580_v52 = vmax.f32 %v5179_v38, 0.0  ;;  %v2582_v53 = vmax.f32 %v5211_v40, 0.0 }
 0x231   :  { %v2615_v56 = vpack.c.bf16 %v2579_v47, %v2575_v45  ;;  %v6591_v57 = vpack.c.bf16 %v2581_v48, %v2577_v46  ;;  %v6098_v47 = vld [vmem:[#allocation5 + $0x3c0] ss:$16 sps:$4 sm:$0xff]   ;;  %v6101_v48 = vld [vmem:[#allocation5 + $0x3c8] ss:$16 sps:$4 sm:$0xff]  }
 0x232   :  { %v2616_v58 = vpack.c.bf16 %v2580_v52, %v2576_v50  ;;  %v6593_v59 = vpack.c.bf16 %v2582_v53, %v2578_v51  ;;  %v2066_v60 = vpop.f32.mrb[28].mxu0  ;;  %v2518_v61 = vpop.f32.mrb[28].mxu1  ;;  %3549 = vmatpush1.bf16.msra.mxu0 %v6080_v42  ;;  %3775 = vmatpush1.bf16.msra.mxu1 %v6083_v43  ;;  %v6109_v50 = vld [vmem:[#allocation5 + $0x3ec] ss:$16 sps:$4 sm:$0xff]   ;;  %v6104_v51 = vld [vmem:[#allocation5 + $0x3e0] ss:$16 sps:$4 sm:$0xff]  }
 0x233   :  { %v5180_v3 = vadd.f32 %v2066_v60, %v6497_v6  ;;  %v5212_v10 = vadd.f32 %v2518_v61, %v6501_v7  ;;  %v2068_v12 = vpop.f32.mrb[29].mxu0  ;;  %v2520_v14 = vpop.f32.mrb[29].mxu1  ;;  %3550 = vmatprep.subr.bf16.mxu0 %v6088_v44  ;;  %3776 = vmatprep.subr.bf16.mxu1 %v6091_v49  ;;  %v6106_v49 = vld [vmem:[#allocation5 + $0x3e4] ss:$16 sps:$4 sm:$0xff]   ;;  %v6107_v52 = vld [vmem:[#allocation5 + $0x3e8] ss:$16 sps:$4 sm:$0xff]  }
 0x234   :  { %v5181_v19 = vadd.f32 %v2068_v12, %v6505_v8  ;;  %v5213_v20 = vadd.f32 %v2520_v14, %v6509_v9  ;;  %v2070_v21 = vpop.f32.mrb[30].mxu0  ;;  %v2522_v22 = vpop.f32.mrb[30].mxu1  ;;  %3505 = vmatprep.mubr.bf16.mxu0 %v2616_v58  ;;  %3731 = vmatprep.mubr.bf16.mxu1 %v2616_v58  ;;  %v6110_v53 = vld [vmem:[%s6856_s5 + $0x40] sm:$0xff]   ;;  %v6114_v60 = vld [vmem:[%s6856_s5 + $0x48] sm:$0xff]   ;;  %v6122_v12 = vld [vmem:[%s6856_s5 + $0x58] sm:$0xff]  }
 0x235   :  { %v5182_v23 = vadd.f32 %v2070_v21, %v6497_v6  ;;  %v5214_v25 = vadd.f32 %v2522_v22, %v6501_v7  ;;  %v2072_v27 = vpop.f32.mrb[31].mxu0  ;;  %v2524_v28 = vpop.f32.mrb[31].mxu1  ;;  %3506 = vmatmul.mubr.bf16.gmra.mrb[56].mxu0 %v2615_v56  ;;  %3732 = vmatmul.mubr.bf16.gmra.mrb[56].mxu1 %v2615_v56  ;;  %v2583_v34 = vmax.f32 %v5180_v3, 0.0  ;;  %v2585_v36 = vmax.f32 %v5212_v10, 0.0  ;;  %v6103_v6 = vld [vmem:[#allocation5 + $0x3cc] ss:$16 sps:$4 sm:$0xff]  }
 0x236   :  { %v5183_v29 = vadd.f32 %v2072_v27, %v6505_v8  ;;  %v5215_v30 = vadd.f32 %v2524_v28, %v6509_v9  ;;  %3551 = vmatpush1.bf16.msra.mxu0 %v6086_v62  ;;  %3777 = vmatpush1.bf16.msra.mxu1 %v6089_v63  ;;  %v2584_v7 = vmax.f32 %v5181_v19, 0.0  ;;  %v2586_v42 = vmax.f32 %v5213_v20, 0.0  ;;  %v6112_v56 = vld [vmem:[%s6856_s5 + $0xc0] sm:$0xff]   ;;  %v6116_v61 = vld [vmem:[%s6856_s5 + $0xc8] sm:$0xff]   ;;  %v6118_v3 = vld [vmem:[%s6856_s5 + $0x50] sm:$0xff]  }
 0x237   :  { %v2587_v38 = vmax.f32 %v5182_v23, 0.0  ;;  %v2589_v40 = vmax.f32 %v5214_v25, 0.0  ;;  %3552 = vmatprep.subr.bf16.mxu0 %v6094_v15  ;;  %3778 = vmatprep.subr.bf16.mxu1 %v6097_v17  ;;  %v6111_v58 = vld [vmem:[%s6856_s5] sm:$0xff]   ;;  %v6115_v62 = vld [vmem:[%s6856_s5 + $0x8] sm:$0xff]   ;;  %v6121_v10 = vld [vmem:[%s6856_s5 + $0x90] sm:$0xff]  }
 0x238   :  { %v2588_v43 = vmax.f32 %v5183_v29, 0.0  ;;  %v2590_v44 = vmax.f32 %v5215_v30, 0.0  ;;  %v6117_v63 = vld [vmem:[%s6856_s5 + $0x88] sm:$0xff]   ;;  %v6124_v14 = vld [vmem:[%s6856_s5 + $0xd8] sm:$0xff]   ;;  %v6126_v19 = vld [vmem:[%s6856_s5 + $0x60] sm:$0xff]  }
 0x239   :  { %v2619_v45 = vpack.c.bf16 %v2587_v38, %v2583_v34  ;;  %v6603_v8 = vpack.c.bf16 %v2589_v40, %v2585_v36  ;;  %v6123_v15 = vld [vmem:[%s6856_s5 + $0x18] sm:$0xff]   ;;  %v6129_v20 = vld [vmem:[%s6856_s5 + $0xa0] sm:$0xff]   ;;  %v6130_v21 = vld [vmem:[%s6856_s5 + $0x68] sm:$0xff]  }
 0x23a   :  { %v2620_v9 = vpack.c.bf16 %v2588_v43, %v2584_v7  ;;  %v6605_v46 = vpack.c.bf16 %v2590_v44, %v2586_v42  ;;  %3553 = vmatpush1.bf16.msra.mxu0 %v6092_v31  ;;  %3779 = vmatpush1.bf16.msra.mxu1 %v6095_v32  ;;  %v6125_v17 = vld [vmem:[%s6856_s5 + $0x98] sm:$0xff]   ;;  %v6132_v22 = vld [vmem:[%s6856_s5 + $0xe8] sm:$0xff]   ;;  %v6134_v27 = vld [vmem:[%s6856_s5 + $0x70] sm:$0xff]  }
 0x23b   :  { %3554 = vmatprep.subr.bf16.mxu0 %v6100_v33  ;;  %3780 = vmatprep.subr.bf16.mxu1 %v6103_v6  ;;  %v6131_v23 = vld [vmem:[%s6856_s5 + $0x28] sm:$0xff]   ;;  %v6137_v28 = vld [vmem:[%s6856_s5 + $0xb0] sm:$0xff]  }
 0x23c   :  { %3515 = vmatprep.mubr.bf16.mxu0 %v2620_v9  ;;  %3741 = vmatprep.mubr.bf16.mxu1 %v2620_v9  ;;  %v6133_v25 = vld [vmem:[%s6856_s5 + $0xa8] sm:$0xff]  }
 0x23d   :  { %3516 = vmatmul.mubr.bf16.gmra.mrb[60].mxu0 %v2619_v45  ;;  %3742 = vmatmul.mubr.bf16.gmra.mrb[60].mxu1 %v2619_v45 }
 0x23e   :  { %3555 = vmatpush1.bf16.msra.mxu0 %v6098_v47  ;;  %3558 = vmatprep.mubr.bf16.mxu0 %v6521_v37 }
 0x23f   :  { %3781 = vmatpush1.bf16.msra.mxu1 %v6101_v48  ;;  %3784 = vmatprep.mubr.bf16.mxu1 %v6521_v37  ;;  %v6113_v37 = vld [vmem:[%s6856_s5 + $0x80] sm:$0xff]  }
 0x240   :  { %3556 = vmatprep.subr.bf16.mxu0 %v6106_v49  ;;  %3782 = vmatprep.subr.bf16.mxu1 %v6109_v50 }
 0x242   :  { %3557 = vmatpush1.bf16.msra.mxu0 %v6104_v51 }
 0x243   :  { %3783 = vmatpush1.bf16.msra.mxu1 %v6107_v52  ;;  %5024 = vmatprep.subr.bf16.mxu0 %v6110_v53 }
 0x244   :  { %5088 = vmatprep.subr.bf16.mxu1 %v6112_v56 }
 0x245   :  { %3559 = vmatmul.mubr.bf16.vlgmr.msra.gmra.mrb[32].mxu0 %v6519_v35 }
 0x246   :  { %3785 = vmatmul.mubr.bf16.vlgmr.msra.gmra.mrb[32].mxu1 %v6519_v35  ;;  %3568 = vmatprep.mubr.bf16.mxu0 %v6533_v18  ;;  %v6120_v35 = vld [vmem:[%s6856_s5 + $0xd0] sm:$0xff]  }
 0x247   :  { %3794 = vmatprep.mubr.bf16.mxu1 %v6533_v18  ;;  %5025 = vmatpush3.bf16.msra.mxu0 %v6111_v58  ;;  %v6119_v18 = vld [vmem:[%s6856_s5 + $0x10] sm:$0xff]  }
 0x248   :  { %5089 = vmatpush3.bf16.msra.mxu1 %v6113_v37  ;;  %5026 = vmatprep.subr.bf16.mxu0 %v6114_v60 }
 0x249   :  { %5090 = vmatprep.subr.bf16.mxu1 %v6116_v61 }
 0x24b   :  { %5027 = vmatpush3.bf16.msra.mxu0 %v6115_v62 }
 0x24c   :  { %5091 = vmatpush3.bf16.msra.mxu1 %v6117_v63  ;;  %5028 = vmatprep.subr.bf16.mxu0 %v6118_v3 }
 0x24d   :  { %3569 = vmatmul.mubr.bf16.gmra.mrb[36].mxu0 %v6531_v16  ;;  %5092 = vmatprep.subr.bf16.mxu1 %v6120_v35 }
 0x24e   :  { %3795 = vmatmul.mubr.bf16.gmra.mrb[36].mxu1 %v6531_v16  ;;  %3578 = vmatprep.mubr.bf16.mxu0 %v6545_v54  ;;  %v6128_v16 = vld [vmem:[%s6856_s5 + $0xe0] sm:$0xff]  }
 0x24f   :  { %3804 = vmatprep.mubr.bf16.mxu1 %v6545_v54  ;;  %5029 = vmatpush3.bf16.msra.mxu0 %v6119_v18  ;;  %v6127_v54 = vld [vmem:[%s6856_s5 + $0x20] sm:$0xff]  }
 0x250   :  { %5093 = vmatpush3.bf16.msra.mxu1 %v6121_v10  ;;  %5030 = vmatprep.subr.bf16.mxu0 %v6122_v12 }
 0x251   :  { %5094 = vmatprep.subr.bf16.mxu1 %v6124_v14 }
 0x253   :  { %5031 = vmatpush3.bf16.msra.mxu0 %v6123_v15 }
 0x254   :  { %5095 = vmatpush3.bf16.msra.mxu1 %v6125_v17  ;;  %5032 = vmatprep.subr.bf16.mxu0 %v6126_v19 }
 0x255   :  { %3579 = vmatmul.mubr.bf16.gmra.mrb[40].mxu0 %v6543_v55  ;;  %5096 = vmatprep.subr.bf16.mxu1 %v6128_v16 }
 0x256   :  { %3805 = vmatmul.mubr.bf16.gmra.mrb[40].mxu1 %v6543_v55  ;;  %3588 = vmatprep.mubr.bf16.mxu0 %v6557_v41  ;;  %v6136_v55 = vld [vmem:[%s6856_s5 + $0xf0] sm:$0xff]  }
 0x257   :  { %3814 = vmatprep.mubr.bf16.mxu1 %v6557_v41  ;;  %5033 = vmatpush3.bf16.msra.mxu0 %v6127_v54  ;;  %v6135_v41 = vld [vmem:[%s6856_s5 + $0x30] sm:$0xff]  }
 0x258   :  { %5097 = vmatpush3.bf16.msra.mxu1 %v6129_v20  ;;  %5034 = vmatprep.subr.bf16.mxu0 %v6130_v21 }
 0x259   :  { %5098 = vmatprep.subr.bf16.mxu1 %v6132_v22 }
 0x25b   :  { %5035 = vmatpush3.bf16.msra.mxu0 %v6131_v23 }
 0x25c   :  { %5099 = vmatpush3.bf16.msra.mxu1 %v6133_v25  ;;  %5036 = vmatprep.subr.bf16.mxu0 %v6134_v27 }
 0x25d   :  { %3589 = vmatmul.mubr.bf16.gmra.mrb[44].mxu0 %v6555_v39  ;;  %5100 = vmatprep.subr.bf16.mxu1 %v6136_v55 }
 0x25e   :  { %3815 = vmatmul.mubr.bf16.gmra.mrb[44].mxu1 %v6555_v39  ;;  %3598 = vmatprep.mubr.bf16.mxu0 %v6569_v26  ;;  %v6138_v39 = vld [vmem:[%s6856_s5 + $0x78] sm:$0xff]  }
 0x25f   :  { %3824 = vmatprep.mubr.bf16.mxu1 %v6569_v26  ;;  %5037 = vmatpush3.bf16.msra.mxu0 %v6135_v41  ;;  %v6139_v26 = vld [vmem:[%s6856_s5 + $0x38] sm:$0xff]  }
 0x260   :  { %5101 = vmatpush3.bf16.msra.mxu1 %v6137_v28  ;;  %5038 = vmatprep.subr.bf16.mxu0 %v6138_v39 }
 0x263   :  { %5039 = vmatpush3.bf16.msra.mxu0 %v6139_v26 }
 0x265   :  { %3599 = vmatmul.mubr.bf16.gmra.mrb[48].mxu0 %v6567_v24 }
 0x266   :  { %3825 = vmatmul.mubr.bf16.gmra.mrb[48].mxu1 %v6567_v24  ;;  %3608 = vmatprep.mubr.bf16.mxu0 %v6581_v13  ;;  %v6140_v24 = vld [vmem:[%s6856_s5 + $0xf8] sm:$0xff]  }
 0x267   :  { %3834 = vmatprep.mubr.bf16.mxu1 %v6581_v13  ;;  %5102 = vmatprep.subr.bf16.mxu1 %v6140_v24  ;;  %v2751_v13 = vld [vmem:[%s6855_s4] sm:$0xf] }
 0x268   :  { %v6748_v29 = vrot.slane %v2751_v13, %v324_v4  ;;  %v6752_v30 = vrot.slane %v2751_v13, %v332_v5 }
 0x26d   :  { %3609 = vmatmul.mubr.bf16.gmra.mrb[52].mxu0 %v6579_v11 }
 0x26e   :  { %3835 = vmatmul.mubr.bf16.gmra.mrb[52].mxu1 %v6579_v11  ;;  %3618 = vmatprep.mubr.bf16.mxu0 %v6593_v59  ;;  %v6141_v11 = vld [vmem:[%s6856_s5 + $0xb8] sm:$0xff]  }
 0x26f   :  { %3844 = vmatprep.mubr.bf16.mxu1 %v6593_v59  ;;  %5103 = vmatpush3.bf16.msra.mxu1 %v6141_v11  ;;  %v6744_v59 = vrot.slane %v2751_v13, %v328_v2 }
 0x275   :  { %3619 = vmatmul.mubr.bf16.gmra.mrb[56].mxu0 %v6591_v57 }
 0x276   :  { %3845 = vmatmul.mubr.bf16.gmra.mrb[56].mxu1 %v6591_v57  ;;  %3628 = vmatprep.mubr.bf16.mxu0 %v6605_v46  ;;  %v6740_v57 = vrot.slane %v2751_v13, %v320_v1 }
 0x277   :  { %3854 = vmatprep.mubr.bf16.mxu1 %v6605_v46 }
 0x27d   :  { %3629 = vmatmul.mubr.bf16.gmra.mrb[60].mxu0 %v6603_v8 }
 0x27e   :  { %3855 = vmatmul.mubr.bf16.gmra.mrb[60].mxu1 %v6603_v8 }
 0x318   :  { %v3560_v31 = vpop.f32.mrb[32].mxu0 }
 0x319   :  { %v5216_v32 = vadd.f32 %v3560_v31, %v6740_v57  ;;  %v3786_v33 = vpop.f32.mrb[32].mxu1  ;;  %v3562_v34 = vpop.f32.mrb[33].mxu0 }
 0x31a   :  { %v5248_v1 = vadd.f32 %v3786_v33, %v6744_v59  ;;  %v5217_v36 = vadd.f32 %v3562_v34, %v6748_v29  ;;  %v3788_v38 = vpop.f32.mrb[33].mxu1  ;;  %v3564_v2 = vpop.f32.mrb[34].mxu0 }
 0x31b   :  { %v5249_v40 = vadd.f32 %v3788_v38, %v6752_v30  ;;  %v5218_v4 = vadd.f32 %v3564_v2, %v6740_v57  ;;  %v3790_v6 = vpop.f32.mrb[34].mxu1  ;;  %v3566_v7 = vpop.f32.mrb[35].mxu0  ;;  %v3865_v43 = vmax.f32 %v5216_v32, 0.0 }
 0x31c   :  { %v5250_v0 = vadd.f32 %v3790_v6, %v6744_v59  ;;  %v5219_v5 = vadd.f32 %v3566_v7, %v6748_v29  ;;  %v3792_v42 = vpop.f32.mrb[35].mxu1  ;;  %v3867_v8 = vmax.f32 %v5248_v1, 0.0  ;;  %v3866_v9 = vmax.f32 %v5217_v36, 0.0 }
 0x31d   :  { %v3869_v44 = vmax.f32 %v5218_v4, 0.0  ;;  %v5251_v45 = vadd.f32 %v3792_v42, %v6752_v30  ;;  %v3868_v48 = vmax.f32 %v5249_v40, 0.0 }
 0x31e   :  { %v3871_v46 = vmax.f32 %v5250_v0, 0.0  ;;  %v3870_v47 = vmax.f32 %v5219_v5, 0.0 }
 0x31f   :  { %v3929_v49 = vpack.c.bf16 %v3869_v44, %v3865_v43  ;;  %v3872_v50 = vmax.f32 %v5251_v45, 0.0 }
 0x320   :  { %v3931_v51 = vpack.c.bf16 %v3871_v46, %v3867_v8  ;;  %v3930_v52 = vpack.c.bf16 %v3870_v47, %v3866_v9  ;;  %v3570_v53 = vpop.f32.mrb[36].mxu0 }
 0x321   :  { %v3932_v56 = vpack.c.bf16 %v3872_v50, %v3868_v48  ;;  %v5220_v58 = vadd.f32 %v3570_v53, %v6740_v57  ;;  %v3796_v37 = vpop.f32.mrb[36].mxu1  ;;  %v3572_v60 = vpop.f32.mrb[37].mxu0 }
 0x322   :  { %v5252_v61 = vadd.f32 %v3796_v37, %v6744_v59  ;;  %v5221_v62 = vadd.f32 %v3572_v60, %v6748_v29  ;;  %v3798_v63 = vpop.f32.mrb[37].mxu1  ;;  %v3574_v3 = vpop.f32.mrb[38].mxu0  ;;  %4256 = vmatprep.mubr.bf16.mxu0 %v3930_v52 }
 0x323   :  { %v5253_v35 = vadd.f32 %v3798_v63, %v6752_v30  ;;  %v5222_v18 = vadd.f32 %v3574_v3, %v6740_v57  ;;  %v3800_v10 = vpop.f32.mrb[38].mxu1  ;;  %4353 = vmatprep.mubr.bf16.mxu1 %v3932_v56  ;;  %v3576_v12 = vpop.f32.mrb[39].mxu0  ;;  %4257 = vmatmul.mubr.bf16.vlgmr.msra.gmra.mrb[64].mxu0 %v3929_v49  ;;  %v3873_v19 = vmax.f32 %v5220_v58, 0.0 }
 0x324   :  { %v5254_v14 = vadd.f32 %v3800_v10, %v6744_v59  ;;  %v5223_v15 = vadd.f32 %v3576_v12, %v6748_v29  ;;  %v3802_v17 = vpop.f32.mrb[39].mxu1  ;;  %4354 = vmatmul.mubr.bf16.vlgmr.msra.gmra.mrb[64].mxu1 %v3931_v51  ;;  %v3875_v20 = vmax.f32 %v5252_v61, 0.0  ;;  %v3874_v21 = vmax.f32 %v5221_v62, 0.0 }
 0x325   :  { %v3877_v16 = vmax.f32 %v5222_v18, 0.0  ;;  %v5255_v54 = vadd.f32 %v3802_v17, %v6752_v30  ;;  %v3876_v25 = vmax.f32 %v5253_v35, 0.0 }
 0x326   :  { %v3879_v22 = vmax.f32 %v5254_v14, 0.0  ;;  %v3878_v23 = vmax.f32 %v5223_v15, 0.0 }
 0x327   :  { %v3933_v27 = vpack.c.bf16 %v3877_v16, %v3873_v19  ;;  %v3880_v55 = vmax.f32 %v5255_v54, 0.0 }
 0x328   :  { %v3935_v41 = vpack.c.bf16 %v3879_v22, %v3875_v20  ;;  %v3934_v28 = vpack.c.bf16 %v3878_v23, %v3874_v21  ;;  %v3580_v39 = vpop.f32.mrb[40].mxu0 }
 0x329   :  { %v3936_v24 = vpack.c.bf16 %v3880_v55, %v3876_v25  ;;  %v5224_v26 = vadd.f32 %v3580_v39, %v6740_v57  ;;  %v3806_v11 = vpop.f32.mrb[40].mxu1  ;;  %v3582_v13 = vpop.f32.mrb[41].mxu0 }
 0x32a   :  { %v5256_v31 = vadd.f32 %v3806_v11, %v6744_v59  ;;  %v5225_v32 = vadd.f32 %v3582_v13, %v6748_v29  ;;  %v3808_v33 = vpop.f32.mrb[41].mxu1  ;;  %v3584_v34 = vpop.f32.mrb[42].mxu0  ;;  %4264 = vmatprep.mubr.bf16.mxu0 %v3934_v28 }
 0x32b   :  { %v5257_v1 = vadd.f32 %v3808_v33, %v6752_v30  ;;  %v5226_v36 = vadd.f32 %v3584_v34, %v6740_v57  ;;  %v3810_v38 = vpop.f32.mrb[42].mxu1  ;;  %4361 = vmatprep.mubr.bf16.mxu1 %v3936_v24  ;;  %v3586_v2 = vpop.f32.mrb[43].mxu0  ;;  %4265 = vmatmul.mubr.bf16.gmra.mrb[68].mxu0 %v3933_v27  ;;  %v3881_v7 = vmax.f32 %v5224_v26, 0.0 }
 0x32c   :  { %v5258_v40 = vadd.f32 %v3810_v38, %v6744_v59  ;;  %v5227_v4 = vadd.f32 %v3586_v2, %v6748_v29  ;;  %v3812_v6 = vpop.f32.mrb[43].mxu1  ;;  %4362 = vmatmul.mubr.bf16.gmra.mrb[68].mxu1 %v3935_v41  ;;  %v3883_v42 = vmax.f32 %v5256_v31, 0.0  ;;  %v3882_v43 = vmax.f32 %v5225_v32, 0.0 }
 0x32d   :  { %v3885_v0 = vmax.f32 %v5226_v36, 0.0  ;;  %v5259_v5 = vadd.f32 %v3812_v6, %v6752_v30  ;;  %v3884_v8 = vmax.f32 %v5257_v1, 0.0 }
 0x32e   :  { %v3887_v44 = vmax.f32 %v5258_v40, 0.0  ;;  %v3886_v45 = vmax.f32 %v5227_v4, 0.0 }
 0x32f   :  { %v3937_v9 = vpack.c.bf16 %v3885_v0, %v3881_v7  ;;  %v3888_v46 = vmax.f32 %v5259_v5, 0.0 }
 0x330   :  { %v3939_v47 = vpack.c.bf16 %v3887_v44, %v3883_v42  ;;  %v3938_v48 = vpack.c.bf16 %v3886_v45, %v3882_v43  ;;  %v3590_v49 = vpop.f32.mrb[44].mxu0 }
 0x331   :  { %v3940_v50 = vpack.c.bf16 %v3888_v46, %v3884_v8  ;;  %v5228_v51 = vadd.f32 %v3590_v49, %v6740_v57  ;;  %v3816_v52 = vpop.f32.mrb[44].mxu1  ;;  %v3592_v53 = vpop.f32.mrb[45].mxu0 }
 0x332   :  { %v5260_v56 = vadd.f32 %v3816_v52, %v6744_v59  ;;  %v5229_v58 = vadd.f32 %v3592_v53, %v6748_v29  ;;  %v3818_v37 = vpop.f32.mrb[45].mxu1  ;;  %v3594_v60 = vpop.f32.mrb[46].mxu0  ;;  %4272 = vmatprep.mubr.bf16.mxu0 %v3938_v48 }
 0x333   :  { %v5261_v61 = vadd.f32 %v3818_v37, %v6752_v30  ;;  %v5230_v62 = vadd.f32 %v3594_v60, %v6740_v57  ;;  %v3820_v63 = vpop.f32.mrb[46].mxu1  ;;  %4369 = vmatprep.mubr.bf16.mxu1 %v3940_v50  ;;  %v3596_v3 = vpop.f32.mrb[47].mxu0  ;;  %4273 = vmatmul.mubr.bf16.gmra.mrb[72].mxu0 %v3937_v9  ;;  %v3889_v12 = vmax.f32 %v5228_v51, 0.0 }
 0x334   :  { %v5262_v35 = vadd.f32 %v3820_v63, %v6744_v59  ;;  %v5231_v18 = vadd.f32 %v3596_v3, %v6748_v29  ;;  %v3822_v10 = vpop.f32.mrb[47].mxu1  ;;  %4370 = vmatmul.mubr.bf16.gmra.mrb[72].mxu1 %v3939_v47  ;;  %v3891_v17 = vmax.f32 %v5260_v56, 0.0  ;;  %v3890_v19 = vmax.f32 %v5229_v58, 0.0 }
 0x335   :  { %v3893_v14 = vmax.f32 %v5230_v62, 0.0  ;;  %v5263_v15 = vadd.f32 %v3822_v10, %v6752_v30  ;;  %v3892_v20 = vmax.f32 %v5261_v61, 0.0 }
 0x336   :  { %v3895_v16 = vmax.f32 %v5262_v35, 0.0  ;;  %v3894_v54 = vmax.f32 %v5231_v18, 0.0 }
 0x337   :  { %v3941_v21 = vpack.c.bf16 %v3893_v14, %v3889_v12  ;;  %v3896_v22 = vmax.f32 %v5263_v15, 0.0 }
 0x338   :  { %v3943_v23 = vpack.c.bf16 %v3895_v16, %v3891_v17  ;;  %v3942_v25 = vpack.c.bf16 %v3894_v54, %v3890_v19  ;;  %v3600_v27 = vpop.f32.mrb[48].mxu0 }
 0x339   :  { %v3944_v55 = vpack.c.bf16 %v3896_v22, %v3892_v20  ;;  %v5232_v41 = vadd.f32 %v3600_v27, %v6740_v57  ;;  %v3826_v28 = vpop.f32.mrb[48].mxu1  ;;  %v3602_v39 = vpop.f32.mrb[49].mxu0 }
 0x33a   :  { %v5264_v24 = vadd.f32 %v3826_v28, %v6744_v59  ;;  %v5233_v26 = vadd.f32 %v3602_v39, %v6748_v29  ;;  %v3828_v11 = vpop.f32.mrb[49].mxu1  ;;  %v3604_v13 = vpop.f32.mrb[50].mxu0  ;;  %4280 = vmatprep.mubr.bf16.mxu0 %v3942_v25 }
 0x33b   :  { %v5265_v31 = vadd.f32 %v3828_v11, %v6752_v30  ;;  %v5234_v32 = vadd.f32 %v3604_v13, %v6740_v57  ;;  %v3830_v33 = vpop.f32.mrb[50].mxu1  ;;  %4377 = vmatprep.mubr.bf16.mxu1 %v3944_v55  ;;  %v3606_v34 = vpop.f32.mrb[51].mxu0  ;;  %4281 = vmatmul.mubr.bf16.gmra.mrb[76].mxu0 %v3941_v21  ;;  %v3897_v2 = vmax.f32 %v5232_v41, 0.0 }
 0x33c   :  { %v5266_v1 = vadd.f32 %v3830_v33, %v6744_v59  ;;  %v5235_v36 = vadd.f32 %v3606_v34, %v6748_v29  ;;  %v3832_v38 = vpop.f32.mrb[51].mxu1  ;;  %4378 = vmatmul.mubr.bf16.gmra.mrb[76].mxu1 %v3943_v23  ;;  %v3899_v6 = vmax.f32 %v5264_v24, 0.0  ;;  %v3898_v7 = vmax.f32 %v5233_v26, 0.0 }
 0x33d   :  { %v3901_v40 = vmax.f32 %v5234_v32, 0.0  ;;  %v5267_v4 = vadd.f32 %v3832_v38, %v6752_v30  ;;  %v3900_v42 = vmax.f32 %v5265_v31, 0.0 }
 0x33e   :  { %v3903_v0 = vmax.f32 %v5266_v1, 0.0  ;;  %v3902_v5 = vmax.f32 %v5235_v36, 0.0 }
 0x33f   :  { %v3945_v43 = vpack.c.bf16 %v3901_v40, %v3897_v2  ;;  %v3904_v44 = vmax.f32 %v5267_v4, 0.0 }
 0x340   :  { %v3947_v45 = vpack.c.bf16 %v3903_v0, %v3899_v6  ;;  %v3946_v8 = vpack.c.bf16 %v3902_v5, %v3898_v7  ;;  %v3610_v9 = vpop.f32.mrb[52].mxu0 }
 0x341   :  { %v3948_v46 = vpack.c.bf16 %v3904_v44, %v3900_v42  ;;  %v5236_v47 = vadd.f32 %v3610_v9, %v6740_v57  ;;  %v3836_v48 = vpop.f32.mrb[52].mxu1  ;;  %v3612_v49 = vpop.f32.mrb[53].mxu0 }
 0x342   :  { %v5268_v50 = vadd.f32 %v3836_v48, %v6744_v59  ;;  %v5237_v51 = vadd.f32 %v3612_v49, %v6748_v29  ;;  %v3838_v52 = vpop.f32.mrb[53].mxu1  ;;  %v3614_v53 = vpop.f32.mrb[54].mxu0  ;;  %4288 = vmatprep.mubr.bf16.mxu0 %v3946_v8 }
 0x343   :  { %v5269_v56 = vadd.f32 %v3838_v52, %v6752_v30  ;;  %v5238_v58 = vadd.f32 %v3614_v53, %v6740_v57  ;;  %v3840_v37 = vpop.f32.mrb[54].mxu1  ;;  %4385 = vmatprep.mubr.bf16.mxu1 %v3948_v46  ;;  %v3616_v60 = vpop.f32.mrb[55].mxu0  ;;  %4289 = vmatmul.mubr.bf16.gmra.mrb[80].mxu0 %v3945_v43  ;;  %v3905_v3 = vmax.f32 %v5236_v47, 0.0 }
 0x344   :  { %v5270_v61 = vadd.f32 %v3840_v37, %v6744_v59  ;;  %v5239_v62 = vadd.f32 %v3616_v60, %v6748_v29  ;;  %v3842_v63 = vpop.f32.mrb[55].mxu1  ;;  %4386 = vmatmul.mubr.bf16.gmra.mrb[80].mxu1 %v3947_v45  ;;  %v3907_v10 = vmax.f32 %v5268_v50, 0.0  ;;  %v3906_v12 = vmax.f32 %v5237_v51, 0.0 }
 0x345   :  { %v3909_v35 = vmax.f32 %v5238_v58, 0.0  ;;  %v5271_v18 = vadd.f32 %v3842_v63, %v6752_v30  ;;  %v3908_v17 = vmax.f32 %v5269_v56, 0.0 }
 0x346   :  { %v3911_v14 = vmax.f32 %v5270_v61, 0.0  ;;  %v3910_v15 = vmax.f32 %v5239_v62, 0.0 }
 0x347   :  { %v3949_v19 = vpack.c.bf16 %v3909_v35, %v3905_v3  ;;  %v3912_v16 = vmax.f32 %v5271_v18, 0.0 }
 0x348   :  { %v3951_v54 = vpack.c.bf16 %v3911_v14, %v3907_v10  ;;  %v3950_v20 = vpack.c.bf16 %v3910_v15, %v3906_v12  ;;  %v3620_v21 = vpop.f32.mrb[56].mxu0 }
 0x349   :  { %v3952_v22 = vpack.c.bf16 %v3912_v16, %v3908_v17  ;;  %v5240_v23 = vadd.f32 %v3620_v21, %v6740_v57  ;;  %v3846_v25 = vpop.f32.mrb[56].mxu1  ;;  %v3622_v27 = vpop.f32.mrb[57].mxu0 }
 0x34a   :  { %v5272_v55 = vadd.f32 %v3846_v25, %v6744_v59  ;;  %v5241_v41 = vadd.f32 %v3622_v27, %v6748_v29  ;;  %v3848_v28 = vpop.f32.mrb[57].mxu1  ;;  %v3624_v39 = vpop.f32.mrb[58].mxu0  ;;  %4296 = vmatprep.mubr.bf16.mxu0 %v3950_v20 }
 0x34b   :  { %v5273_v24 = vadd.f32 %v3848_v28, %v6752_v30  ;;  %v5242_v26 = vadd.f32 %v3624_v39, %v6740_v57  ;;  %v3850_v11 = vpop.f32.mrb[58].mxu1  ;;  %4393 = vmatprep.mubr.bf16.mxu1 %v3952_v22  ;;  %v3626_v13 = vpop.f32.mrb[59].mxu0  ;;  %4297 = vmatmul.mubr.bf16.gmra.mrb[84].mxu0 %v3949_v19  ;;  %v3913_v34 = vmax.f32 %v5240_v23, 0.0 }
 0x34c   :  { %v5274_v31 = vadd.f32 %v3850_v11, %v6744_v59  ;;  %v5243_v32 = vadd.f32 %v3626_v13, %v6748_v29  ;;  %v3852_v33 = vpop.f32.mrb[59].mxu1  ;;  %4394 = vmatmul.mubr.bf16.gmra.mrb[84].mxu1 %v3951_v54  ;;  %v3915_v38 = vmax.f32 %v5272_v55, 0.0  ;;  %v3914_v2 = vmax.f32 %v5241_v41, 0.0 }
 0x34d   :  { %v3917_v1 = vmax.f32 %v5242_v26, 0.0  ;;  %v5275_v36 = vadd.f32 %v3852_v33, %v6752_v30  ;;  %v3916_v6 = vmax.f32 %v5273_v24, 0.0 }
 0x34e   :  { %v3919_v40 = vmax.f32 %v5274_v31, 0.0  ;;  %v3918_v4 = vmax.f32 %v5243_v32, 0.0 }
 0x34f   :  { %v3953_v7 = vpack.c.bf16 %v3917_v1, %v3913_v34  ;;  %v3920_v0 = vmax.f32 %v5275_v36, 0.0 }
 0x350   :  { %v3955_v5 = vpack.c.bf16 %v3919_v40, %v3915_v38  ;;  %v3954_v42 = vpack.c.bf16 %v3918_v4, %v3914_v2  ;;  %v3630_v43 = vpop.f32.mrb[60].mxu0 }
 0x351   :  { %v3956_v44 = vpack.c.bf16 %v3920_v0, %v3916_v6  ;;  %v5244_v45 = vadd.f32 %v3630_v43, %v6740_v57  ;;  %v3856_v8 = vpop.f32.mrb[60].mxu1  ;;  %v3632_v9 = vpop.f32.mrb[61].mxu0 }
 0x352   :  { %v5276_v46 = vadd.f32 %v3856_v8, %v6744_v59  ;;  %v5245_v47 = vadd.f32 %v3632_v9, %v6748_v29  ;;  %v3858_v48 = vpop.f32.mrb[61].mxu1  ;;  %v3634_v49 = vpop.f32.mrb[62].mxu0  ;;  %4304 = vmatprep.mubr.bf16.mxu0 %v3954_v42 }
 0x353   :  { %v5277_v50 = vadd.f32 %v3858_v48, %v6752_v30  ;;  %v5246_v51 = vadd.f32 %v3634_v49, %v6740_v57  ;;  %v3860_v52 = vpop.f32.mrb[62].mxu1  ;;  %4401 = vmatprep.mubr.bf16.mxu1 %v3956_v44  ;;  %v3636_v53 = vpop.f32.mrb[63].mxu0  ;;  %4305 = vmatmul.mubr.bf16.gmra.mrb[88].mxu0 %v3953_v7  ;;  %v3921_v60 = vmax.f32 %v5244_v45, 0.0 }
 0x354   :  { %v5278_v56 = vadd.f32 %v3860_v52, %v6744_v59  ;;  %v5247_v58 = vadd.f32 %v3636_v53, %v6748_v29  ;;  %v3862_v37 = vpop.f32.mrb[63].mxu1  ;;  %4402 = vmatmul.mubr.bf16.gmra.mrb[88].mxu1 %v3955_v5  ;;  %v3923_v63 = vmax.f32 %v5276_v46, 0.0  ;;  %v3922_v3 = vmax.f32 %v5245_v47, 0.0 }
 0x355   :  { %v3925_v61 = vmax.f32 %v5246_v51, 0.0  ;;  %v5279_v62 = vadd.f32 %v3862_v37, %v6752_v30  ;;  %v3924_v10 = vmax.f32 %v5277_v50, 0.0  ;;  %v6821_v30 = vld [vmem:[%s6857_s6] ss:$0 sm:$0xff]  ;;  %s6219_s6 = smov [#allocation7]  }
 0x356   :  { %v3927_v35 = vmax.f32 %v5278_v56, 0.0  ;;  %v3926_v18 = vmax.f32 %v5247_v58, 0.0  ;;  %s4503_s25 = sshll.u32 %s6219_s6, 4  ;;  %s4504_s25 = int_to_ptr.vmem [resolvable:$true] %s4503_s25 }
 0x357   :  { %v3957_v57 = vpack.c.bf16 %v3925_v61, %v3921_v60  ;;  %v3928_v12 = vmax.f32 %v5279_v62, 0.0  ;;  %s6186_s3 = scalar_lea.vmem %s4504_s25, 1024  ;;  %p6191_p3 = scmp.lt.s32.totalorder %s4504_s25, %s4504_s25 }
 0x358   :  { %v3959_v14 = vpack.c.bf16 %v3927_v35, %v3923_v63  ;;  %v3958_v15 = vpack.c.bf16 %v3926_v18, %v3922_v3  ;;  %p6187_p2 = scmp.ne.s32.totalorder %s4504_s25, %s6186_s3  ;;  %p6192_p4 = scmp.lt.s32.totalorder %s6186_s3, %s6186_s3 }
 0x359   :  { %v3960_v17 = vpack.c.bf16 %v3928_v12, %v3924_v10 }
 0x35a   :  { %4312 = vmatprep.mubr.bf16.mxu0 %v3958_v15  ;;  %p6193_p5 = por %p6192_p4, %p6191_p3 }
 0x35b   :  { %4409 = vmatprep.mubr.bf16.mxu1 %v3960_v17  ;;  %4313 = vmatmul.mubr.bf16.gmra.mrb[92].mxu0 %v3957_v57 }
 0x35c   :  { %4410 = vmatmul.mubr.bf16.gmra.mrb[92].mxu1 %v3959_v14  ;;  %p6194_p6 = pnand %p6193_p5, %p6187_p2 }
 0x3f6   :  { %v5040_v59 = vpop.f32.mrb[64].mxu0 }
 0x3f7   :  { %v5104_v29 = vpop.f32.mrb[64].mxu1  ;;  %v5041_v19 = vpop.f32.mrb[65].mxu0 }
 0x3f8   :  { %v5042_v16 = vadd.f32 %v5041_v19, %v5040_v59  ;;  %v5105_v54 = vpop.f32.mrb[65].mxu1  ;;  %v5043_v20 = vpop.f32.mrb[66].mxu0 }
 0x3f9   :  { %v5106_v21 = vadd.f32 %v5105_v54, %v5104_v29  ;;  %v5107_v22 = vpop.f32.mrb[66].mxu1  ;;  %v5044_v23 = vpop.f32.mrb[67].mxu0 }
 0x3fa   :  { %v4259_v25 = vadd.f32 %v5042_v16, %v6821_v30  ;;  %v5045_v27 = vadd.f32 %v5044_v23, %v5043_v20  ;;  %v5108_v55 = vpop.f32.mrb[67].mxu1 }
 0x3fb   :  { %v5109_v41 = vadd.f32 %v5108_v55, %v5107_v22 }
 0x3fc   :  { %v4356_v28 = vadd.f32 %v5106_v21, %v4259_v25  ;;  %v4262_v39 = vadd.f32 %v5045_v27, %v6821_v30 }
 0x3fe   :  { %v4359_v24 = vadd.f32 %v5109_v41, %v4262_v39  ;;  %v5046_v26 = vpop.f32.mrb[68].mxu0 }
 0x3ff   :  { %v5110_v11 = vpop.f32.mrb[68].mxu1  ;;  %v5047_v13 = vpop.f32.mrb[69].mxu0 }
 0x400   :  { %v4980_v31 = vpack.c.bf16 %v4359_v24, %v4356_v28  ;;  %v5048_v32 = vadd.f32 %v5047_v13, %v5046_v26  ;;  %v5111_v33 = vpop.f32.mrb[69].mxu1  ;;  %v5049_v34 = vpop.f32.mrb[70].mxu0 }
 0x401   :  { %v5112_v1 = vadd.f32 %v5111_v33, %v5110_v11  ;;  %v5113_v36 = vpop.f32.mrb[70].mxu1  ;;  %v5050_v38 = vpop.f32.mrb[71].mxu0 }
 0x402   :  { %4981 = vst [vmem:[#allocation7] sm:$0xff] %v4980_v31   ;;  %v4267_v2 = vadd.f32 %v5048_v32, %v6821_v30  ;;  %v5051_v40 = vadd.f32 %v5050_v38, %v5049_v34  ;;  %v5114_v4 = vpop.f32.mrb[71].mxu1 }
 0x403   :  { %v5115_v6 = vadd.f32 %v5114_v4, %v5113_v36 }
 0x404   :  { %v4364_v7 = vadd.f32 %v5112_v1, %v4267_v2  ;;  %v4270_v0 = vadd.f32 %v5051_v40, %v6821_v30 }
 0x406   :  { %v4367_v5 = vadd.f32 %v5115_v6, %v4270_v0  ;;  %v5052_v42 = vpop.f32.mrb[72].mxu0 }
 0x407   :  { %v5116_v43 = vpop.f32.mrb[72].mxu1  ;;  %v5053_v44 = vpop.f32.mrb[73].mxu0 }
 0x408   :  { %v4985_v45 = vpack.c.bf16 %v4367_v5, %v4364_v7  ;;  %v5054_v8 = vadd.f32 %v5053_v44, %v5052_v42  ;;  %v5117_v9 = vpop.f32.mrb[73].mxu1  ;;  %v5055_v46 = vpop.f32.mrb[74].mxu0 }
 0x409   :  { %v5118_v47 = vadd.f32 %v5117_v9, %v5116_v43  ;;  %v5119_v48 = vpop.f32.mrb[74].mxu1  ;;  %v5056_v49 = vpop.f32.mrb[75].mxu0 }
 0x40a   :  { %5017 = vst [vmem:[#allocation7 + $0x8] sm:$0xff] %v4985_v45   ;;  %v4275_v50 = vadd.f32 %v5054_v8, %v6821_v30  ;;  %v5057_v51 = vadd.f32 %v5056_v49, %v5055_v46  ;;  %v5120_v52 = vpop.f32.mrb[75].mxu1 }
 0x40b   :  { %v5121_v53 = vadd.f32 %v5120_v52, %v5119_v48 }
 0x40c   :  { %v4372_v56 = vadd.f32 %v5118_v47, %v4275_v50  ;;  %v4278_v58 = vadd.f32 %v5057_v51, %v6821_v30 }
 0x40e   :  { %v4375_v37 = vadd.f32 %v5121_v53, %v4278_v58  ;;  %v5058_v60 = vpop.f32.mrb[76].mxu0 }
 0x40f   :  { %v5122_v61 = vpop.f32.mrb[76].mxu1  ;;  %v5059_v62 = vpop.f32.mrb[77].mxu0 }
 0x410   :  { %v4990_v63 = vpack.c.bf16 %v4375_v37, %v4372_v56  ;;  %v5060_v3 = vadd.f32 %v5059_v62, %v5058_v60  ;;  %v5123_v35 = vpop.f32.mrb[77].mxu1  ;;  %v5061_v18 = vpop.f32.mrb[78].mxu0 }
 0x411   :  { %v5124_v10 = vadd.f32 %v5123_v35, %v5122_v61  ;;  %v5125_v57 = vpop.f32.mrb[78].mxu1  ;;  %v5062_v12 = vpop.f32.mrb[79].mxu0 }
 0x412   :  { %5018 = vst [vmem:[#allocation7 + $0x10] sm:$0xff] %v4990_v63   ;;  %v4283_v14 = vadd.f32 %v5060_v3, %v6821_v30  ;;  %v5063_v15 = vadd.f32 %v5062_v12, %v5061_v18  ;;  %v5126_v17 = vpop.f32.mrb[79].mxu1 }
 0x413   :  { %v5127_v59 = vadd.f32 %v5126_v17, %v5125_v57 }
 0x414   :  { %v4380_v29 = vadd.f32 %v5124_v10, %v4283_v14  ;;  %v4286_v19 = vadd.f32 %v5063_v15, %v6821_v30 }
 0x416   :  { %v4383_v16 = vadd.f32 %v5127_v59, %v4286_v19  ;;  %v5064_v54 = vpop.f32.mrb[80].mxu0 }
 0x417   :  { %v5128_v20 = vpop.f32.mrb[80].mxu1  ;;  %v5065_v21 = vpop.f32.mrb[81].mxu0 }
 0x418   :  { %v4995_v22 = vpack.c.bf16 %v4383_v16, %v4380_v29  ;;  %v5066_v23 = vadd.f32 %v5065_v21, %v5064_v54  ;;  %v5129_v25 = vpop.f32.mrb[81].mxu1  ;;  %v5067_v27 = vpop.f32.mrb[82].mxu0 }
 0x419   :  { %v5130_v55 = vadd.f32 %v5129_v25, %v5128_v20  ;;  %v5131_v41 = vpop.f32.mrb[82].mxu1  ;;  %v5068_v28 = vpop.f32.mrb[83].mxu0 }
 0x41a   :  { %5019 = vst [vmem:[#allocation7 + $0x18] sm:$0xff] %v4995_v22   ;;  %v4291_v39 = vadd.f32 %v5066_v23, %v6821_v30  ;;  %v5069_v24 = vadd.f32 %v5068_v28, %v5067_v27  ;;  %v5132_v26 = vpop.f32.mrb[83].mxu1 }
 0x41b   :  { %v5133_v11 = vadd.f32 %v5132_v26, %v5131_v41 }
 0x41c   :  { %v4388_v13 = vadd.f32 %v5130_v55, %v4291_v39  ;;  %v4294_v31 = vadd.f32 %v5069_v24, %v6821_v30 }
 0x41e   :  { %v4391_v32 = vadd.f32 %v5133_v11, %v4294_v31  ;;  %v5070_v33 = vpop.f32.mrb[84].mxu0 }
 0x41f   :  { %v5134_v34 = vpop.f32.mrb[84].mxu1  ;;  %v5071_v1 = vpop.f32.mrb[85].mxu0 }
 0x420   :  { %v5000_v36 = vpack.c.bf16 %v4391_v32, %v4388_v13  ;;  %v5072_v38 = vadd.f32 %v5071_v1, %v5070_v33  ;;  %v5135_v2 = vpop.f32.mrb[85].mxu1  ;;  %v5073_v40 = vpop.f32.mrb[86].mxu0 }
 0x421   :  { %v5136_v4 = vadd.f32 %v5135_v2, %v5134_v34  ;;  %v5137_v6 = vpop.f32.mrb[86].mxu1  ;;  %v5074_v7 = vpop.f32.mrb[87].mxu0 }
 0x422   :  { %5020 = vst [vmem:[#allocation7 + $0x20] sm:$0xff] %v5000_v36   ;;  %v4299_v0 = vadd.f32 %v5072_v38, %v6821_v30  ;;  %v5075_v5 = vadd.f32 %v5074_v7, %v5073_v40  ;;  %v5138_v42 = vpop.f32.mrb[87].mxu1 }
 0x423   :  { %v5139_v43 = vadd.f32 %v5138_v42, %v5137_v6 }
 0x424   :  { %v4396_v44 = vadd.f32 %v5136_v4, %v4299_v0  ;;  %v4302_v45 = vadd.f32 %v5075_v5, %v6821_v30 }
 0x426   :  { %v4399_v8 = vadd.f32 %v5139_v43, %v4302_v45  ;;  %v5076_v9 = vpop.f32.mrb[88].mxu0 }
 0x427   :  { %v5140_v46 = vpop.f32.mrb[88].mxu1  ;;  %v5077_v47 = vpop.f32.mrb[89].mxu0 }
 0x428   :  { %v5005_v48 = vpack.c.bf16 %v4399_v8, %v4396_v44  ;;  %v5078_v49 = vadd.f32 %v5077_v47, %v5076_v9  ;;  %v5141_v50 = vpop.f32.mrb[89].mxu1  ;;  %v5079_v51 = vpop.f32.mrb[90].mxu0 }
 0x429   :  { %v5142_v52 = vadd.f32 %v5141_v50, %v5140_v46  ;;  %v5143_v53 = vpop.f32.mrb[90].mxu1  ;;  %v5080_v56 = vpop.f32.mrb[91].mxu0 }
 0x42a   :  { %5021 = vst [vmem:[#allocation7 + $0x28] sm:$0xff] %v5005_v48   ;;  %v4307_v58 = vadd.f32 %v5078_v49, %v6821_v30  ;;  %v5081_v37 = vadd.f32 %v5080_v56, %v5079_v51  ;;  %v5144_v60 = vpop.f32.mrb[91].mxu1 }
 0x42b   :  { %v5145_v61 = vadd.f32 %v5144_v60, %v5143_v53 }
 0x42c   :  { %v4404_v62 = vadd.f32 %v5142_v52, %v4307_v58  ;;  %v4310_v63 = vadd.f32 %v5081_v37, %v6821_v30 }
 0x42e   :  { %v4407_v3 = vadd.f32 %v5145_v61, %v4310_v63  ;;  %v5082_v35 = vpop.f32.mrb[92].mxu0 }
 0x42f   :  { %v5146_v18 = vpop.f32.mrb[92].mxu1  ;;  %v5083_v10 = vpop.f32.mrb[93].mxu0 }
 0x430   :  { %v5010_v57 = vpack.c.bf16 %v4407_v3, %v4404_v62  ;;  %v5084_v12 = vadd.f32 %v5083_v10, %v5082_v35  ;;  %v5147_v14 = vpop.f32.mrb[93].mxu1  ;;  %v5085_v15 = vpop.f32.mrb[94].mxu0 }
 0x431   :  { %v5148_v17 = vadd.f32 %v5147_v14, %v5146_v18  ;;  %v5149_v59 = vpop.f32.mrb[94].mxu1  ;;  %v5086_v29 = vpop.f32.mrb[95].mxu0 }
 0x432   :  { %5022 = vst [vmem:[#allocation7 + $0x30] sm:$0xff] %v5010_v57   ;;  %v4315_v19 = vadd.f32 %v5084_v12, %v6821_v30  ;;  %v5087_v16 = vadd.f32 %v5086_v29, %v5085_v15  ;;  %v5150_v54 = vpop.f32.mrb[95].mxu1 }
 0x433   :  { %v5151_v20 = vadd.f32 %v5150_v54, %v5149_v59 }
 0x434   :  { %v4412_v21 = vadd.f32 %v5148_v17, %v4315_v19  ;;  %v4318_v22 = vadd.f32 %v5087_v16, %v6821_v30 }
 0x436   :  { %v4415_v23 = vadd.f32 %v5151_v20, %v4318_v22 }
 0x438   :  { %v5015_v25 = vpack.c.bf16 %v4415_v23, %v4412_v21 }
 0x43a   :  { %5023 = vst [vmem:[#allocation7 + $0x38] sm:$0xff] %v5015_v25  }
 0x43b   :  { %6197 = shalt.err (!%p6194_p6)
}
 0x43c   :  { %s6198_s28 = scalar_lea.hbm %s6858_s7, 1024 }
 0x43d   :  { %p6199_p7 = scmp.ne.s32.totalorder %s6858_s7, %s6198_s28  ;;  %p6202_p8 = scmp.lt.u32.totalorder %s6198_s28, %s6858_s7 }
 0x43f   :  { %p6204_p9 = pnand %p6202_p8, %p6199_p7 }
 0x441   :  { %6207 = shalt.err (!%p6204_p9)
}
 0x442   :  { %s6220_s10 = smov 64   ;;  %s6221_s11 = smov 4  }
 0x443   :  { %4509 = dma.vmem_to_hbm [thread:$0]  %s4504_s25, 1024, %s6858_s7, [#allocation4], %s6220_s10, %s6220_s10, %s6221_s11  }
 0x444   :  { %6212 = dma.done.wait [#allocation4], 1024  }
 0x445   :  { %6213 = vsyncadd [#allocation4], 4294966272 }
 0x446   :  { %4513 = vsyncpa [#allocation3], 1 }
 0x447   :  { %4514 = vsyncpa [#allocation6], 1 }
 0x448   :  { %4515 = vsyncpa [#allocation4], 1 }

</bundles_post_ra>
